<compile_context>
chip_gen: v6e
topology: v6e:2x2x1
jax: 0.10.0
libtpu: 0.0.40
codegen_flags: <defaults>
</compile_context>

<pallas_src>
import functools

import jax
import jax.numpy as jnp
import numpy as np
from jax.experimental import pallas as pl
from jax.experimental.pallas import tpu as pltpu


# ----------------------------- Pallas kernel --------------------------------
def _gru_decoder_kernel(x_ref, g_ref,
                        wih0_ref, w_h0_ref, wih1_ref, whh1_ref, wlin1_ref,
                        a2_ref, b2_ref,
                        out_ref,
                        *, batch, seq_len, hidden_size, eps):
    """Single invocation: statically-unrolled time loop, state carried in vregs.

    x_ref    : [T*B, E]   time-major decoder inputs
    g_ref    : [2, B, H]  initial hidden states (h[0], h[1])
    wih0_ref : [E, 3H]    gru_l0.weight_ih^T  (gate order r, z, n)
    w_h0_ref : [H, 4H]    [gru_l0.weight_hh^T | linear.weight^T[:H]]  (fused)
    wih1_ref : [H, 3H]    gru_l1.weight_ih^T
    whh1_ref : [H, 3H]    gru_l1.weight_hh^T
    wlin1_ref: [H, H]     linear.weight^T[H:]
    a2_ref / b2_ref : [1, 1, H]  LayerNorm scale / shift
    out_ref  : [B, T, H]
    """
    B, T, H = batch, seq_len, hidden_size

    def dot(a, b):
        return jnp.dot(a, b, preferred_element_type=jnp.float32)

    # ---- loop-invariant ref loads hoisted out of the unrolled loop ----
    w_h0 = w_h0_ref[...]          # [H, 4H]
    whh1 = whh1_ref[...]          # [H, 3H]
    wih1 = wih1_ref[...]          # [H, 3H]
    wlin1 = wlin1_ref[...]        # [H, H]
    h0 = g_ref[0]                 # [B, H]  carried h[0]
    h1 = g_ref[1]                 # [B, H]  carried h[1]

    # ---- prologue: time-independent layer-0 input projection (one MXU push,
    #      off the serial per-step path).  Gate order along lanes: r | z | n.
    gi0_all = dot(x_ref[...], wih0_ref[...])          # [T*B, 3H]

    # ---- serial recurrence (statically unrolled; state in vregs) ----
    # TODO(synk): for large T, switch to lax.fori_loop carrying (h0, h1) with unroll=2..4
    # to bound vreg live ranges; at the toy T=6 a full static unroll is best.
    for t in range(T):
        gi0 = gi0_all[t * B:(t + 1) * B, :]           # [B, 3H] this step's input gates

        # step-start recurrent projections: two independent pushes (pipeline in the MXU)
        pa = dot(h0, w_h0)                            # [B, 4H]: gh0_r | gh0_z | gh0_n | lin0
        pb = dot(h1, whh1)                            # [B, 3H]: gh1_r | gh1_z | gh1_n

        # ---- gru_l0 elementwise ----
        r0 = jax.nn.sigmoid(gi0[:, :H] + pa[:, :H])
        z0 = jax.nn.sigmoid(gi0[:, H:2 * H] + pa[:, H:2 * H])
        n0 = jnp.tanh(gi0[:, 2 * H:] + r0 * pa[:, 2 * H:3 * H])
        h1_new = (1.0 - z0) * n0 + z0 * h0            # gru_l0 output

        # ---- gru_l1 (only its input projection sits on the serial chain) ----
        gi1 = dot(h1_new, wih1)                       # [B, 3H]
        r1 = jax.nn.sigmoid(gi1[:, :H] + pb[:, :H])
        z1 = jax.nn.sigmoid(gi1[:, H:2 * H] + pb[:, H:2 * H])
        n1 = jnp.tanh(gi1[:, 2 * H:] + r1 * pb[:, 2 * H:])
        h2_new = (1.0 - z1) * n1 + z1 * h1            # gru_l1 output

        # drop(h2) -> identity (eval); attn(L, h_) returns h_ unchanged (dead bmm in ref).
        # TODO(synk): training-mode dropout (random mask) not implemented; eval semantics used.
        # linear(cat([h[0], h_])).tanh() split by linearity: the h0 half (lin0) was fused
        # into `pa`, so no per-step concatenate and only one push remains on the chain.
        h0_new = jnp.tanh(pa[:, 3 * H:] + dot(h2_new, wlin1))

        out_ref[:, t, :] = h0_new                     # raw state; LayerNorm hoisted below

        # carry state in vregs
        h0, h1 = h0_new, h2_new

    # ---- epilogue: one batched LayerNorm over all [B, T, H] rows ----
    # (the normalized value never feeds the recurrence, so this is off the hot loop)
    y = out_ref[...]
    mean = jnp.mean(y, axis=-1, keepdims=True)
    xc = y - mean
    var = jnp.sum(xc * xc, axis=-1, keepdims=True) * (1.0 / (H - 1))   # torch.std: ddof=1
    inv = pl.reciprocal(jnp.sqrt(var) + eps, approx=False)             # exact (1e-4 tol)
    out_ref[...] = a2_ref[...] * xc * inv + b2_ref[...]


def gru_decoder_forward(X, G, L, params, *, eps=1e-6):
    """X: [B, T, E], G: [2, B, H], L: [B, N, H] (unused by the reference forward)."""
    del L  # L does not affect the output (see notes at top of file)
    wih0, whh0, wih1, whh1, wlin, a2, b2 = (params[k] for k in
                                            ("wih0", "whh0", "wih1", "whh1", "wlin", "a2", "b2"))
    B, T, E = X.shape
    H = G.shape[-1]

    f32 = jnp.float32
    Gf = G.astype(f32)

    # Pre-transposed weights; PyTorch gate stacking (r,z,n along rows) means a plain
    # transpose already gives lane-stacked gate outputs at offsets 0 / H / 2H.
    wih0_T = wih0.T.astype(f32)                       # [E, 3H]
    whh0_T = whh0.T.astype(f32)                       # [H, 3H]
    wih1_T = wih1.T.astype(f32)                       # [H, 3H]
    whh1_T = whh1.T.astype(f32)                       # [H, 3H]
    wlin_T = wlin.T.astype(f32)                       # [2H, H]

    # Fused step-start weight: one push yields all layer-0 recurrent gates AND the
    # h0-half of the linear-combine.
    w_h0 = jnp.concatenate([whh0_T, wlin_T[:H]], axis=1)   # [H, 4H]
    wlin_bot = wlin_T[H:]                                   # [H, H]

    a2_3d = a2.reshape(1, 1, H).astype(f32)
    b2_3d = b2.reshape(1, 1, H).astype(f32)

    # Time-major flat input so the layer-0 input projection is a single in-kernel push.
    x2d = jnp.transpose(X.astype(f32), (1, 0, 2)).reshape(T * B, E)     # [T*B, E]

    kernel = functools.partial(_gru_decoder_kernel,
                               batch=B, seq_len=T, hidden_size=H, eps=eps)

    vmem = pl.BlockSpec(memory_space=pltpu.MemorySpace.VMEM)

    # Single invocation (no grid): every operand whole-array VMEM-resident (total < 0.5 MiB
    # on every generation incl. v7x's 64 MiB VMEM); no per-step pipeline overhead.
    # TODO(synk): for real batched workloads on v7x, add a leading "parallel" grid axis so
    # both TensorCores are used; at this toy size splitting would only underfill the MXU.
    out = pl.pallas_call(
        kernel,
        out_shape=jax.ShapeDtypeStruct((B, T, H), jnp.float32),
        in_specs=[vmem] * 9,
        out_specs=vmem,
    )(x2d, Gf, wih0_T, w_h0, wih1_T, whh1_T, wlin_bot, a2_3d, b2_3d)

    return out                                                          # [B, T, H]


# --------------------------- pure-JAX reference ------------------------------
def gru_decoder_reference(X, G, L, params, *, eps=1e-6):
    del L
    wih0, whh0, wih1, whh1, wlin, a2, b2 = (params[k] for k in
                                            ("wih0", "whh0", "wih1", "whh1", "wlin", "a2", "b2"))
    H = G.shape[-1]

    def gru(x, h, wih, whh):
        gi = x @ wih.T
        gh = h @ whh.T
        r = jax.nn.sigmoid(gi[:, :H] + gh[:, :H])
        z = jax.nn.sigmoid(gi[:, H:2 * H] + gh[:, H:2 * H])
        n = jnp.tanh(gi[:, 2 * H:] + r * gh[:, 2 * H:])
        return (1.0 - z) * n + z * h

    h0, h1 = G[0], G[1]
    outs = []
    for t in range(X.shape[1]):
        x = X[:, t, :]
        a = gru(x, h0, wih0, whh0)
        b = gru(a, h1, wih1, whh1)
        h0 = jnp.tanh(jnp.concatenate([h0, b], axis=1) @ wlin.T)
        h1 = b
        outs.append(h0)
    out = jnp.stack(outs, axis=1)
    mean = out.mean(-1, keepdims=True)
    std = jnp.std(out, axis=-1, keepdims=True, ddof=1)
    return a2 * (out - mean) / (std + eps) + b2


# --------------------------------- main --------------------------------------
if __name__ == "__main__":
    B, T, E, H, N = 4, 6, 32, 32, 8     # batch, seq, n_embs, hidden_size, #local vectors

    key = jax.random.PRNGKey(0)
    ks = jax.random.split(key, 10)
    bound = 1.0 / np.sqrt(H)
    u = lambda k, shape: jax.random.uniform(k, shape, jnp.float32, -bound, bound)

    params = {
        "wih0": u(ks[0], (3 * H, E)),    # gru_l0.weight_ih
        "whh0": u(ks[1], (3 * H, H)),    # gru_l0.weight_hh
        "wih1": u(ks[2], (3 * H, H)),    # gru_l1.weight_ih
        "whh1": u(ks[3], (3 * H, H)),    # gru_l1.weight_hh
        "wlin": u(ks[4], (H, 2 * H)),    # linear.weight
        "a2": jnp.ones((H,), jnp.float32),   # LayerNorm scale
        "b2": jnp.zeros((H,), jnp.float32),  # LayerNorm shift
    }

    X = jax.random.normal(ks[5], (B, T, E), jnp.float32)
    G = jax.random.normal(ks[6], (2, B, H), jnp.float32)
    L = jax.random.normal(ks[7], (B, N, H), jnp.float32)   # accepted but unused (see notes)

    out = jax.block_until_ready(gru_decoder_forward(X, G, L, params))
    ref = jax.block_until_ready(gru_decoder_reference(X, G, L, params))

    assert out.shape == (B, T, H), out.shape
    np.testing.assert_allclose(np.asarray(out), np.asarray(ref), rtol=1e-4, atol=1e-4)
    print("KERNEL_OK")
</pallas_src>

<mosaic_0001>
module attributes {stable_mosaic.version = 11 : i64} {
  func.func @_gru_decoder_kernel(%arg0: memref<24x32xf32, #tpu.memory_space<vmem>>, %arg1: memref<2x4x32xf32, #tpu.memory_space<vmem>>, %arg2: memref<32x96xf32, #tpu.memory_space<vmem>>, %arg3: memref<32x128xf32, #tpu.memory_space<vmem>>, %arg4: memref<32x96xf32, #tpu.memory_space<vmem>>, %arg5: memref<32x96xf32, #tpu.memory_space<vmem>>, %arg6: memref<32x32xf32, #tpu.memory_space<vmem>>, %arg7: memref<1x1x32xf32, #tpu.memory_space<vmem>>, %arg8: memref<1x1x32xf32, #tpu.memory_space<vmem>>, %arg9: memref<4x6x32xf32, #tpu.memory_space<vmem>>) attributes {dimension_semantics = [], scalar_prefetch = 0 : i64, scratch_operands = 0 : i64, tpu.core_type = #tpu.core_type<tc>} {
    %c0 = arith.constant 0 : index
    %c0_0 = arith.constant 0 : index
    %0 = vector.load %arg3[%c0, %c0_0] : memref<32x128xf32, #tpu.memory_space<vmem>>, vector<32x128xf32>
    %c0_1 = arith.constant 0 : index
    %c0_2 = arith.constant 0 : index
    %1 = vector.load %arg5[%c0_1, %c0_2] : memref<32x96xf32, #tpu.memory_space<vmem>>, vector<32x96xf32>
    %c0_3 = arith.constant 0 : index
    %c0_4 = arith.constant 0 : index
    %2 = vector.load %arg4[%c0_3, %c0_4] : memref<32x96xf32, #tpu.memory_space<vmem>>, vector<32x96xf32>
    %c0_5 = arith.constant 0 : index
    %c0_6 = arith.constant 0 : index
    %3 = vector.load %arg6[%c0_5, %c0_6] : memref<32x32xf32, #tpu.memory_space<vmem>>, vector<32x32xf32>
    %c0_7 = arith.constant 0 : index
    %c0_8 = arith.constant 0 : index
    %c0_9 = arith.constant 0 : index
    %4 = vector.load %arg1[%c0_7, %c0_8, %c0_9] : memref<2x4x32xf32, #tpu.memory_space<vmem>>, vector<1x4x32xf32>
    %5 = vector.shape_cast %4 : vector<1x4x32xf32> to vector<4x32xf32>
    %c1 = arith.constant 1 : index
    %c0_10 = arith.constant 0 : index
    %c0_11 = arith.constant 0 : index
    %6 = vector.load %arg1[%c1, %c0_10, %c0_11] : memref<2x4x32xf32, #tpu.memory_space<vmem>>, vector<1x4x32xf32>
    %7 = vector.shape_cast %6 : vector<1x4x32xf32> to vector<4x32xf32>
    %c0_12 = arith.constant 0 : index
    %c0_13 = arith.constant 0 : index
    %8 = vector.load %arg0[%c0_12, %c0_13] : memref<24x32xf32, #tpu.memory_space<vmem>>, vector<24x32xf32>
    %c0_14 = arith.constant 0 : index
    %c0_15 = arith.constant 0 : index
    %9 = vector.load %arg2[%c0_14, %c0_15] : memref<32x96xf32, #tpu.memory_space<vmem>>, vector<32x96xf32>
    %cst = arith.constant dense<0.000000e+00> : vector<24x96xf32>
    %10 = tpu.matmul %8, %9, %cst {dimension_numbers = #tpu.dot_dimension_numbers<[1], [0], [0], [1], [0, 0, 1, 1], [], []>} : vector<24x32xf32>, vector<32x96xf32>, vector<24x96xf32> -> vector<24x96xf32>
    %11 = vector.extract_strided_slice %10 {offsets = [0, 0], sizes = [4, 96], strides = [1, 1]} : vector<24x96xf32> to vector<4x96xf32>
    %cst_16 = arith.constant dense<0.000000e+00> : vector<4x128xf32>
    %12 = tpu.matmul %5, %0, %cst_16 {dimension_numbers = #tpu.dot_dimension_numbers<[1], [0], [0], [1], [0, 0, 1, 1], [], []>} : vector<4x32xf32>, vector<32x128xf32>, vector<4x128xf32> -> vector<4x128xf32>
    %cst_17 = arith.constant dense<0.000000e+00> : vector<4x96xf32>
    %13 = tpu.matmul %7, %1, %cst_17 {dimension_numbers = #tpu.dot_dimension_numbers<[1], [0], [0], [1], [0, 0, 1, 1], [], []>} : vector<4x32xf32>, vector<32x96xf32>, vector<4x96xf32> -> vector<4x96xf32>
    %14 = vector.extract_strided_slice %11 {offsets = [0, 0], sizes = [4, 32], strides = [1, 1]} : vector<4x96xf32> to vector<4x32xf32>
    %15 = vector.extract_strided_slice %12 {offsets = [0, 0], sizes = [4, 32], strides = [1, 1]} : vector<4x128xf32> to vector<4x32xf32>
    %16 = arith.addf %14, %15 : vector<4x32xf32>
    %17 = arith.negf %16 : vector<4x32xf32>
    %18 = math.exp %17 : vector<4x32xf32>
    %cst_18 = arith.constant 1.000000e+00 : f32
    %19 = vector.broadcast %cst_18 : f32 to vector<4x32xf32>
    %20 = arith.addf %19, %18 : vector<4x32xf32>
    %21 = arith.divf %19, %20 : vector<4x32xf32>
    %22 = vector.extract_strided_slice %11 {offsets = [0, 32], sizes = [4, 32], strides = [1, 1]} : vector<4x96xf32> to vector<4x32xf32>
    %23 = vector.extract_strided_slice %12 {offsets = [0, 32], sizes = [4, 32], strides = [1, 1]} : vector<4x128xf32> to vector<4x32xf32>
    %24 = arith.addf %22, %23 : vector<4x32xf32>
    %25 = arith.negf %24 : vector<4x32xf32>
    %26 = math.exp %25 : vector<4x32xf32>
    %cst_19 = arith.constant 1.000000e+00 : f32
    %27 = vector.broadcast %cst_19 : f32 to vector<4x32xf32>
    %28 = arith.addf %27, %26 : vector<4x32xf32>
    %29 = arith.divf %27, %28 : vector<4x32xf32>
    %30 = vector.extract_strided_slice %11 {offsets = [0, 64], sizes = [4, 32], strides = [1, 1]} : vector<4x96xf32> to vector<4x32xf32>
    %31 = vector.extract_strided_slice %12 {offsets = [0, 64], sizes = [4, 32], strides = [1, 1]} : vector<4x128xf32> to vector<4x32xf32>
    %32 = arith.mulf %21, %31 : vector<4x32xf32>
    %33 = arith.addf %30, %32 : vector<4x32xf32>
    %34 = math.tanh %33 : vector<4x32xf32>
    %cst_20 = arith.constant 1.000000e+00 : f32
    %35 = vector.broadcast %cst_20 : f32 to vector<4x32xf32>
    %36 = arith.subf %35, %29 : vector<4x32xf32>
    %37 = arith.mulf %36, %34 : vector<4x32xf32>
    %38 = arith.mulf %29, %5 : vector<4x32xf32>
    %39 = arith.addf %37, %38 : vector<4x32xf32>
    %cst_21 = arith.constant dense<0.000000e+00> : vector<4x96xf32>
    %40 = tpu.matmul %39, %2, %cst_21 {dimension_numbers = #tpu.dot_dimension_numbers<[1], [0], [0], [1], [0, 0, 1, 1], [], []>} : vector<4x32xf32>, vector<32x96xf32>, vector<4x96xf32> -> vector<4x96xf32>
    %41 = vector.extract_strided_slice %40 {offsets = [0, 0], sizes = [4, 32], strides = [1, 1]} : vector<4x96xf32> to vector<4x32xf32>
    %42 = vector.extract_strided_slice %13 {offsets = [0, 0], sizes = [4, 32], strides = [1, 1]} : vector<4x96xf32> to vector<4x32xf32>
    %43 = arith.addf %41, %42 : vector<4x32xf32>
    %44 = arith.negf %43 : vector<4x32xf32>
    %45 = math.exp %44 : vector<4x32xf32>
    %cst_22 = arith.constant 1.000000e+00 : f32
    %46 = vector.broadcast %cst_22 : f32 to vector<4x32xf32>
    %47 = arith.addf %46, %45 : vector<4x32xf32>
    %48 = arith.divf %46, %47 : vector<4x32xf32>
    %49 = vector.extract_strided_slice %40 {offsets = [0, 32], sizes = [4, 32], strides = [1, 1]} : vector<4x96xf32> to vector<4x32xf32>
    %50 = vector.extract_strided_slice %13 {offsets = [0, 32], sizes = [4, 32], strides = [1, 1]} : vector<4x96xf32> to vector<4x32xf32>
    %51 = arith.addf %49, %50 : vector<4x32xf32>
    %52 = arith.negf %51 : vector<4x32xf32>
    %53 = math.exp %52 : vector<4x32xf32>
    %cst_23 = arith.constant 1.000000e+00 : f32
    %54 = vector.broadcast %cst_23 : f32 to vector<4x32xf32>
    %55 = arith.addf %54, %53 : vector<4x32xf32>
    %56 = arith.divf %54, %55 : vector<4x32xf32>
    %57 = vector.extract_strided_slice %40 {offsets = [0, 64], sizes = [4, 32], strides = [1, 1]} : vector<4x96xf32> to vector<4x32xf32>
    %58 = vector.extract_strided_slice %13 {offsets = [0, 64], sizes = [4, 32], strides = [1, 1]} : vector<4x96xf32> to vector<4x32xf32>
    %59 = arith.mulf %48, %58 : vector<4x32xf32>
    %60 = arith.addf %57, %59 : vector<4x32xf32>
    %61 = math.tanh %60 : vector<4x32xf32>
    %cst_24 = arith.constant 1.000000e+00 : f32
    %62 = vector.broadcast %cst_24 : f32 to vector<4x32xf32>
    %63 = arith.subf %62, %56 : vector<4x32xf32>
    %64 = arith.mulf %63, %61 : vector<4x32xf32>
    %65 = arith.mulf %56, %7 : vector<4x32xf32>
    %66 = arith.addf %64, %65 : vector<4x32xf32>
    %67 = vector.extract_strided_slice %12 {offsets = [0, 96], sizes = [4, 32], strides = [1, 1]} : vector<4x128xf32> to vector<4x32xf32>
    %cst_25 = arith.constant dense<0.000000e+00> : vector<4x32xf32>
    %68 = tpu.matmul %66, %3, %cst_25 {dimension_numbers = #tpu.dot_dimension_numbers<[1], [0], [0], [1], [0, 0, 1, 1], [], []>} : vector<4x32xf32>, vector<32x32xf32>, vector<4x32xf32> -> vector<4x32xf32>
    %69 = arith.addf %67, %68 : vector<4x32xf32>
    %70 = math.tanh %69 : vector<4x32xf32>
    %c0_26 = arith.constant 0 : index
    %c0_27 = arith.constant 0 : index
    %c0_28 = arith.constant 0 : index
    %71 = vector.load %arg9[%c0_26, %c0_27, %c0_28] : memref<4x6x32xf32, #tpu.memory_space<vmem>>, vector<4x1x32xf32>
    %72 = vector.shape_cast %71 : vector<4x1x32xf32> to vector<4x32xf32>
    %73 = vector.shape_cast %70 : vector<4x32xf32> to vector<4x1x32xf32>
    tpu.vector_store %arg9[%c0_26, %c0_27, %c0_28], %73 {strides = array<i32>} : memref<4x6x32xf32, #tpu.memory_space<vmem>>, vector<4x1x32xf32>,
    %74 = vector.extract_strided_slice %10 {offsets = [4, 0], sizes = [4, 96], strides = [1, 1]} : vector<24x96xf32> to vector<4x96xf32>
    %cst_29 = arith.constant dense<0.000000e+00> : vector<4x128xf32>
    %75 = tpu.matmul %70, %0, %cst_29 {dimension_numbers = #tpu.dot_dimension_numbers<[1], [0], [0], [1], [0, 0, 1, 1], [], []>} : vector<4x32xf32>, vector<32x128xf32>, vector<4x128xf32> -> vector<4x128xf32>
    %cst_30 = arith.constant dense<0.000000e+00> : vector<4x96xf32>
    %76 = tpu.matmul %66, %1, %cst_30 {dimension_numbers = #tpu.dot_dimension_numbers<[1], [0], [0], [1], [0, 0, 1, 1], [], []>} : vector<4x32xf32>, vector<32x96xf32>, vector<4x96xf32> -> vector<4x96xf32>
    %77 = vector.extract_strided_slice %74 {offsets = [0, 0], sizes = [4, 32], strides = [1, 1]} : vector<4x96xf32> to vector<4x32xf32>
    %78 = vector.extract_strided_slice %75 {offsets = [0, 0], sizes = [4, 32], strides = [1, 1]} : vector<4x128xf32> to vector<4x32xf32>
    %79 = arith.addf %77, %78 : vector<4x32xf32>
    %80 = arith.negf %79 : vector<4x32xf32>
    %81 = math.exp %80 : vector<4x32xf32>
    %cst_31 = arith.constant 1.000000e+00 : f32
    %82 = vector.broadcast %cst_31 : f32 to vector<4x32xf32>
    %83 = arith.addf %82, %81 : vector<4x32xf32>
    %84 = arith.divf %82, %83 : vector<4x32xf32>
    %85 = vector.extract_strided_slice %74 {offsets = [0, 32], sizes = [4, 32], strides = [1, 1]} : vector<4x96xf32> to vector<4x32xf32>
    %86 = vector.extract_strided_slice %75 {offsets = [0, 32], sizes = [4, 32], strides = [1, 1]} : vector<4x128xf32> to vector<4x32xf32>
    %87 = arith.addf %85, %86 : vector<4x32xf32>
    %88 = arith.negf %87 : vector<4x32xf32>
    %89 = math.exp %88 : vector<4x32xf32>
    %cst_32 = arith.constant 1.000000e+00 : f32
    %90 = vector.broadcast %cst_32 : f32 to vector<4x32xf32>
    %91 = arith.addf %90, %89 : vector<4x32xf32>
    %92 = arith.divf %90, %91 : vector<4x32xf32>
    %93 = vector.extract_strided_slice %74 {offsets = [0, 64], sizes = [4, 32], strides = [1, 1]} : vector<4x96xf32> to vector<4x32xf32>
    %94 = vector.extract_strided_slice %75 {offsets = [0, 64], sizes = [4, 32], strides = [1, 1]} : vector<4x128xf32> to vector<4x32xf32>
    %95 = arith.mulf %84, %94 : vector<4x32xf32>
    %96 = arith.addf %93, %95 : vector<4x32xf32>
    %97 = math.tanh %96 : vector<4x32xf32>
    %cst_33 = arith.constant 1.000000e+00 : f32
    %98 = vector.broadcast %cst_33 : f32 to vector<4x32xf32>
    %99 = arith.subf %98, %92 : vector<4x32xf32>
    %100 = arith.mulf %99, %97 : vector<4x32xf32>
    %101 = arith.mulf %92, %70 : vector<4x32xf32>
    %102 = arith.addf %100, %101 : vector<4x32xf32>
    %cst_34 = arith.constant dense<0.000000e+00> : vector<4x96xf32>
    %103 = tpu.matmul %102, %2, %cst_34 {dimension_numbers = #tpu.dot_dimension_numbers<[1], [0], [0], [1], [0, 0, 1, 1], [], []>} : vector<4x32xf32>, vector<32x96xf32>, vector<4x96xf32> -> vector<4x96xf32>
    %104 = vector.extract_strided_slice %103 {offsets = [0, 0], sizes = [4, 32], strides = [1, 1]} : vector<4x96xf32> to vector<4x32xf32>
    %105 = vector.extract_strided_slice %76 {offsets = [0, 0], sizes = [4, 32], strides = [1, 1]} : vector<4x96xf32> to vector<4x32xf32>
    %106 = arith.addf %104, %105 : vector<4x32xf32>
    %107 = arith.negf %106 : vector<4x32xf32>
    %108 = math.exp %107 : vector<4x32xf32>
    %cst_35 = arith.constant 1.000000e+00 : f32
    %109 = vector.broadcast %cst_35 : f32 to vector<4x32xf32>
    %110 = arith.addf %109, %108 : vector<4x32xf32>
    %111 = arith.divf %109, %110 : vector<4x32xf32>
    %112 = vector.extract_strided_slice %103 {offsets = [0, 32], sizes = [4, 32], strides = [1, 1]} : vector<4x96xf32> to vector<4x32xf32>
    %113 = vector.extract_strided_slice %76 {offsets = [0, 32], sizes = [4, 32], strides = [1, 1]} : vector<4x96xf32> to vector<4x32xf32>
    %114 = arith.addf %112, %113 : vector<4x32xf32>
    %115 = arith.negf %114 : vector<4x32xf32>
    %116 = math.exp %115 : vector<4x32xf32>
    %cst_36 = arith.constant 1.000000e+00 : f32
    %117 = vector.broadcast %cst_36 : f32 to vector<4x32xf32>
    %118 = arith.addf %117, %116 : vector<4x32xf32>
    %119 = arith.divf %117, %118 : vector<4x32xf32>
    %120 = vector.extract_strided_slice %103 {offsets = [0, 64], sizes = [4, 32], strides = [1, 1]} : vector<4x96xf32> to vector<4x32xf32>
    %121 = vector.extract_strided_slice %76 {offsets = [0, 64], sizes = [4, 32], strides = [1, 1]} : vector<4x96xf32> to vector<4x32xf32>
    %122 = arith.mulf %111, %121 : vector<4x32xf32>
    %123 = arith.addf %120, %122 : vector<4x32xf32>
    %124 = math.tanh %123 : vector<4x32xf32>
    %cst_37 = arith.constant 1.000000e+00 : f32
    %125 = vector.broadcast %cst_37 : f32 to vector<4x32xf32>
    %126 = arith.subf %125, %119 : vector<4x32xf32>
    %127 = arith.mulf %126, %124 : vector<4x32xf32>
    %128 = arith.mulf %119, %66 : vector<4x32xf32>
    %129 = arith.addf %127, %128 : vector<4x32xf32>
    %130 = vector.extract_strided_slice %75 {offsets = [0, 96], sizes = [4, 32], strides = [1, 1]} : vector<4x128xf32> to vector<4x32xf32>
    %cst_38 = arith.constant dense<0.000000e+00> : vector<4x32xf32>
    %131 = tpu.matmul %129, %3, %cst_38 {dimension_numbers = #tpu.dot_dimension_numbers<[1], [0], [0], [1], [0, 0, 1, 1], [], []>} : vector<4x32xf32>, vector<32x32xf32>, vector<4x32xf32> -> vector<4x32xf32>
    %132 = arith.addf %130, %131 : vector<4x32xf32>
    %133 = math.tanh %132 : vector<4x32xf32>
    %c0_39 = arith.constant 0 : index
    %c1_40 = arith.constant 1 : index
    %c0_41 = arith.constant 0 : index
    %134 = vector.load %arg9[%c0_39, %c1_40, %c0_41] : memref<4x6x32xf32, #tpu.memory_space<vmem>>, vector<4x1x32xf32>
    %135 = vector.shape_cast %134 : vector<4x1x32xf32> to vector<4x32xf32>
    %136 = vector.shape_cast %133 : vector<4x32xf32> to vector<4x1x32xf32>
    tpu.vector_store %arg9[%c0_39, %c1_40, %c0_41], %136 {strides = array<i32>} : memref<4x6x32xf32, #tpu.memory_space<vmem>>, vector<4x1x32xf32>,
    %137 = vector.extract_strided_slice %10 {offsets = [8, 0], sizes = [4, 96], strides = [1, 1]} : vector<24x96xf32> to vector<4x96xf32>
    %cst_42 = arith.constant dense<0.000000e+00> : vector<4x128xf32>
    %138 = tpu.matmul %133, %0, %cst_42 {dimension_numbers = #tpu.dot_dimension_numbers<[1], [0], [0], [1], [0, 0, 1, 1], [], []>} : vector<4x32xf32>, vector<32x128xf32>, vector<4x128xf32> -> vector<4x128xf32>
    %cst_43 = arith.constant dense<0.000000e+00> : vector<4x96xf32>
    %139 = tpu.matmul %129, %1, %cst_43 {dimension_numbers = #tpu.dot_dimension_numbers<[1], [0], [0], [1], [0, 0, 1, 1], [], []>} : vector<4x32xf32>, vector<32x96xf32>, vector<4x96xf32> -> vector<4x96xf32>
    %140 = vector.extract_strided_slice %137 {offsets = [0, 0], sizes = [4, 32], strides = [1, 1]} : vector<4x96xf32> to vector<4x32xf32>
    %141 = vector.extract_strided_slice %138 {offsets = [0, 0], sizes = [4, 32], strides = [1, 1]} : vector<4x128xf32> to vector<4x32xf32>
    %142 = arith.addf %140, %141 : vector<4x32xf32>
    %143 = arith.negf %142 : vector<4x32xf32>
    %144 = math.exp %143 : vector<4x32xf32>
    %cst_44 = arith.constant 1.000000e+00 : f32
    %145 = vector.broadcast %cst_44 : f32 to vector<4x32xf32>
    %146 = arith.addf %145, %144 : vector<4x32xf32>
    %147 = arith.divf %145, %146 : vector<4x32xf32>
    %148 = vector.extract_strided_slice %137 {offsets = [0, 32], sizes = [4, 32], strides = [1, 1]} : vector<4x96xf32> to vector<4x32xf32>
    %149 = vector.extract_strided_slice %138 {offsets = [0, 32], sizes = [4, 32], strides = [1, 1]} : vector<4x128xf32> to vector<4x32xf32>
    %150 = arith.addf %148, %149 : vector<4x32xf32>
    %151 = arith.negf %150 : vector<4x32xf32>
    %152 = math.exp %151 : vector<4x32xf32>
    %cst_45 = arith.constant 1.000000e+00 : f32
    %153 = vector.broadcast %cst_45 : f32 to vector<4x32xf32>
    %154 = arith.addf %153, %152 : vector<4x32xf32>
    %155 = arith.divf %153, %154 : vector<4x32xf32>
    %156 = vector.extract_strided_slice %137 {offsets = [0, 64], sizes = [4, 32], strides = [1, 1]} : vector<4x96xf32> to vector<4x32xf32>
    %157 = vector.extract_strided_slice %138 {offsets = [0, 64], sizes = [4, 32], strides = [1, 1]} : vector<4x128xf32> to vector<4x32xf32>
    %158 = arith.mulf %147, %157 : vector<4x32xf32>
    %159 = arith.addf %156, %158 : vector<4x32xf32>
    %160 = math.tanh %159 : vector<4x32xf32>
    %cst_46 = arith.constant 1.000000e+00 : f32
    %161 = vector.broadcast %cst_46 : f32 to vector<4x32xf32>
    %162 = arith.subf %161, %155 : vector<4x32xf32>
    %163 = arith.mulf %162, %160 : vector<4x32xf32>
    %164 = arith.mulf %155, %133 : vector<4x32xf32>
    %165 = arith.addf %163, %164 : vector<4x32xf32>
    %cst_47 = arith.constant dense<0.000000e+00> : vector<4x96xf32>
    %166 = tpu.matmul %165, %2, %cst_47 {dimension_numbers = #tpu.dot_dimension_numbers<[1], [0], [0], [1], [0, 0, 1, 1], [], []>} : vector<4x32xf32>, vector<32x96xf32>, vector<4x96xf32> -> vector<4x96xf32>
    %167 = vector.extract_strided_slice %166 {offsets = [0, 0], sizes = [4, 32], strides = [1, 1]} : vector<4x96xf32> to vector<4x32xf32>
    %168 = vector.extract_strided_slice %139 {offsets = [0, 0], sizes = [4, 32], strides = [1, 1]} : vector<4x96xf32> to vector<4x32xf32>
    %169 = arith.addf %167, %168 : vector<4x32xf32>
    %170 = arith.negf %169 : vector<4x32xf32>
    %171 = math.exp %170 : vector<4x32xf32>
    %cst_48 = arith.constant 1.000000e+00 : f32
    %172 = vector.broadcast %cst_48 : f32 to vector<4x32xf32>
    %173 = arith.addf %172, %171 : vector<4x32xf32>
    %174 = arith.divf %172, %173 : vector<4x32xf32>
    %175 = vector.extract_strided_slice %166 {offsets = [0, 32], sizes = [4, 32], strides = [1, 1]} : vector<4x96xf32> to vector<4x32xf32>
    %176 = vector.extract_strided_slice %139 {offsets = [0, 32], sizes = [4, 32], strides = [1, 1]} : vector<4x96xf32> to vector<4x32xf32>
    %177 = arith.addf %175, %176 : vector<4x32xf32>
    %178 = arith.negf %177 : vector<4x32xf32>
    %179 = math.exp %178 : vector<4x32xf32>
    %cst_49 = arith.constant 1.000000e+00 : f32
    %180 = vector.broadcast %cst_49 : f32 to vector<4x32xf32>
    %181 = arith.addf %180, %179 : vector<4x32xf32>
    %182 = arith.divf %180, %181 : vector<4x32xf32>
    %183 = vector.extract_strided_slice %166 {offsets = [0, 64], sizes = [4, 32], strides = [1, 1]} : vector<4x96xf32> to vector<4x32xf32>
    %184 = vector.extract_strided_slice %139 {offsets = [0, 64], sizes = [4, 32], strides = [1, 1]} : vector<4x96xf32> to vector<4x32xf32>
    %185 = arith.mulf %174, %184 : vector<4x32xf32>
    %186 = arith.addf %183, %185 : vector<4x32xf32>
    %187 = math.tanh %186 : vector<4x32xf32>
    %cst_50 = arith.constant 1.000000e+00 : f32
    %188 = vector.broadcast %cst_50 : f32 to vector<4x32xf32>
    %189 = arith.subf %188, %182 : vector<4x32xf32>
    %190 = arith.mulf %189, %187 : vector<4x32xf32>
    %191 = arith.mulf %182, %129 : vector<4x32xf32>
    %192 = arith.addf %190, %191 : vector<4x32xf32>
    %193 = vector.extract_strided_slice %138 {offsets = [0, 96], sizes = [4, 32], strides = [1, 1]} : vector<4x128xf32> to vector<4x32xf32>
    %cst_51 = arith.constant dense<0.000000e+00> : vector<4x32xf32>
    %194 = tpu.matmul %192, %3, %cst_51 {dimension_numbers = #tpu.dot_dimension_numbers<[1], [0], [0], [1], [0, 0, 1, 1], [], []>} : vector<4x32xf32>, vector<32x32xf32>, vector<4x32xf32> -> vector<4x32xf32>
    %195 = arith.addf %193, %194 : vector<4x32xf32>
    %196 = math.tanh %195 : vector<4x32xf32>
    %c0_52 = arith.constant 0 : index
    %c2 = arith.constant 2 : index
    %c0_53 = arith.constant 0 : index
    %197 = vector.load %arg9[%c0_52, %c2, %c0_53] : memref<4x6x32xf32, #tpu.memory_space<vmem>>, vector<4x1x32xf32>
    %198 = vector.shape_cast %197 : vector<4x1x32xf32> to vector<4x32xf32>
    %199 = vector.shape_cast %196 : vector<4x32xf32> to vector<4x1x32xf32>
    tpu.vector_store %arg9[%c0_52, %c2, %c0_53], %199 {strides = array<i32>} : memref<4x6x32xf32, #tpu.memory_space<vmem>>, vector<4x1x32xf32>,
    %200 = vector.extract_strided_slice %10 {offsets = [12, 0], sizes = [4, 96], strides = [1, 1]} : vector<24x96xf32> to vector<4x96xf32>
    %cst_54 = arith.constant dense<0.000000e+00> : vector<4x128xf32>
    %201 = tpu.matmul %196, %0, %cst_54 {dimension_numbers = #tpu.dot_dimension_numbers<[1], [0], [0], [1], [0, 0, 1, 1], [], []>} : vector<4x32xf32>, vector<32x128xf32>, vector<4x128xf32> -> vector<4x128xf32>
    %cst_55 = arith.constant dense<0.000000e+00> : vector<4x96xf32>
    %202 = tpu.matmul %192, %1, %cst_55 {dimension_numbers = #tpu.dot_dimension_numbers<[1], [0], [0], [1], [0, 0, 1, 1], [], []>} : vector<4x32xf32>, vector<32x96xf32>, vector<4x96xf32> -> vector<4x96xf32>
    %203 = vector.extract_strided_slice %200 {offsets = [0, 0], sizes = [4, 32], strides = [1, 1]} : vector<4x96xf32> to vector<4x32xf32>
    %204 = vector.extract_strided_slice %201 {offsets = [0, 0], sizes = [4, 32], strides = [1, 1]} : vector<4x128xf32> to vector<4x32xf32>
    %205 = arith.addf %203, %204 : vector<4x32xf32>
    %206 = arith.negf %205 : vector<4x32xf32>
    %207 = math.exp %206 : vector<4x32xf32>
    %cst_56 = arith.constant 1.000000e+00 : f32
    %208 = vector.broadcast %cst_56 : f32 to vector<4x32xf32>
    %209 = arith.addf %208, %207 : vector<4x32xf32>
    %210 = arith.divf %208, %209 : vector<4x32xf32>
    %211 = vector.extract_strided_slice %200 {offsets = [0, 32], sizes = [4, 32], strides = [1, 1]} : vector<4x96xf32> to vector<4x32xf32>
    %212 = vector.extract_strided_slice %201 {offsets = [0, 32], sizes = [4, 32], strides = [1, 1]} : vector<4x128xf32> to vector<4x32xf32>
    %213 = arith.addf %211, %212 : vector<4x32xf32>
    %214 = arith.negf %213 : vector<4x32xf32>
    %215 = math.exp %214 : vector<4x32xf32>
    %cst_57 = arith.constant 1.000000e+00 : f32
    %216 = vector.broadcast %cst_57 : f32 to vector<4x32xf32>
    %217 = arith.addf %216, %215 : vector<4x32xf32>
    %218 = arith.divf %216, %217 : vector<4x32xf32>
    %219 = vector.extract_strided_slice %200 {offsets = [0, 64], sizes = [4, 32], strides = [1, 1]} : vector<4x96xf32> to vector<4x32xf32>
    %220 = vector.extract_strided_slice %201 {offsets = [0, 64], sizes = [4, 32], strides = [1, 1]} : vector<4x128xf32> to vector<4x32xf32>
    %221 = arith.mulf %210, %220 : vector<4x32xf32>
    %222 = arith.addf %219, %221 : vector<4x32xf32>
    %223 = math.tanh %222 : vector<4x32xf32>
    %cst_58 = arith.constant 1.000000e+00 : f32
    %224 = vector.broadcast %cst_58 : f32 to vector<4x32xf32>
    %225 = arith.subf %224, %218 : vector<4x32xf32>
    %226 = arith.mulf %225, %223 : vector<4x32xf32>
    %227 = arith.mulf %218, %196 : vector<4x32xf32>
    %228 = arith.addf %226, %227 : vector<4x32xf32>
    %cst_59 = arith.constant dense<0.000000e+00> : vector<4x96xf32>
    %229 = tpu.matmul %228, %2, %cst_59 {dimension_numbers = #tpu.dot_dimension_numbers<[1], [0], [0], [1], [0, 0, 1, 1], [], []>} : vector<4x32xf32>, vector<32x96xf32>, vector<4x96xf32> -> vector<4x96xf32>
    %230 = vector.extract_strided_slice %229 {offsets = [0, 0], sizes = [4, 32], strides = [1, 1]} : vector<4x96xf32> to vector<4x32xf32>
    %231 = vector.extract_strided_slice %202 {offsets = [0, 0], sizes = [4, 32], strides = [1, 1]} : vector<4x96xf32> to vector<4x32xf32>
    %232 = arith.addf %230, %231 : vector<4x32xf32>
    %233 = arith.negf %232 : vector<4x32xf32>
    %234 = math.exp %233 : vector<4x32xf32>
    %cst_60 = arith.constant 1.000000e+00 : f32
    %235 = vector.broadcast %cst_60 : f32 to vector<4x32xf32>
    %236 = arith.addf %235, %234 : vector<4x32xf32>
    %237 = arith.divf %235, %236 : vector<4x32xf32>
    %238 = vector.extract_strided_slice %229 {offsets = [0, 32], sizes = [4, 32], strides = [1, 1]} : vector<4x96xf32> to vector<4x32xf32>
    %239 = vector.extract_strided_slice %202 {offsets = [0, 32], sizes = [4, 32], strides = [1, 1]} : vector<4x96xf32> to vector<4x32xf32>
    %240 = arith.addf %238, %239 : vector<4x32xf32>
    %241 = arith.negf %240 : vector<4x32xf32>
    %242 = math.exp %241 : vector<4x32xf32>
    %cst_61 = arith.constant 1.000000e+00 : f32
    %243 = vector.broadcast %cst_61 : f32 to vector<4x32xf32>
    %244 = arith.addf %243, %242 : vector<4x32xf32>
    %245 = arith.divf %243, %244 : vector<4x32xf32>
    %246 = vector.extract_strided_slice %229 {offsets = [0, 64], sizes = [4, 32], strides = [1, 1]} : vector<4x96xf32> to vector<4x32xf32>
    %247 = vector.extract_strided_slice %202 {offsets = [0, 64], sizes = [4, 32], strides = [1, 1]} : vector<4x96xf32> to vector<4x32xf32>
    %248 = arith.mulf %237, %247 : vector<4x32xf32>
    %249 = arith.addf %246, %248 : vector<4x32xf32>
    %250 = math.tanh %249 : vector<4x32xf32>
    %cst_62 = arith.constant 1.000000e+00 : f32
    %251 = vector.broadcast %cst_62 : f32 to vector<4x32xf32>
    %252 = arith.subf %251, %245 : vector<4x32xf32>
    %253 = arith.mulf %252, %250 : vector<4x32xf32>
    %254 = arith.mulf %245, %192 : vector<4x32xf32>
    %255 = arith.addf %253, %254 : vector<4x32xf32>
    %256 = vector.extract_strided_slice %201 {offsets = [0, 96], sizes = [4, 32], strides = [1, 1]} : vector<4x128xf32> to vector<4x32xf32>
    %cst_63 = arith.constant dense<0.000000e+00> : vector<4x32xf32>
    %257 = tpu.matmul %255, %3, %cst_63 {dimension_numbers = #tpu.dot_dimension_numbers<[1], [0], [0], [1], [0, 0, 1, 1], [], []>} : vector<4x32xf32>, vector<32x32xf32>, vector<4x32xf32> -> vector<4x32xf32>
    %258 = arith.addf %256, %257 : vector<4x32xf32>
    %259 = math.tanh %258 : vector<4x32xf32>
    %c0_64 = arith.constant 0 : index
    %c3 = arith.constant 3 : index
    %c0_65 = arith.constant 0 : index
    %260 = vector.load %arg9[%c0_64, %c3, %c0_65] : memref<4x6x32xf32, #tpu.memory_space<vmem>>, vector<4x1x32xf32>
    %261 = vector.shape_cast %260 : vector<4x1x32xf32> to vector<4x32xf32>
    %262 = vector.shape_cast %259 : vector<4x32xf32> to vector<4x1x32xf32>
    tpu.vector_store %arg9[%c0_64, %c3, %c0_65], %262 {strides = array<i32>} : memref<4x6x32xf32, #tpu.memory_space<vmem>>, vector<4x1x32xf32>,
    %263 = vector.extract_strided_slice %10 {offsets = [16, 0], sizes = [4, 96], strides = [1, 1]} : vector<24x96xf32> to vector<4x96xf32>
    %cst_66 = arith.constant dense<0.000000e+00> : vector<4x128xf32>
    %264 = tpu.matmul %259, %0, %cst_66 {dimension_numbers = #tpu.dot_dimension_numbers<[1], [0], [0], [1], [0, 0, 1, 1], [], []>} : vector<4x32xf32>, vector<32x128xf32>, vector<4x128xf32> -> vector<4x128xf32>
    %cst_67 = arith.constant dense<0.000000e+00> : vector<4x96xf32>
    %265 = tpu.matmul %255, %1, %cst_67 {dimension_numbers = #tpu.dot_dimension_numbers<[1], [0], [0], [1], [0, 0, 1, 1], [], []>} : vector<4x32xf32>, vector<32x96xf32>, vector<4x96xf32> -> vector<4x96xf32>
    %266 = vector.extract_strided_slice %263 {offsets = [0, 0], sizes = [4, 32], strides = [1, 1]} : vector<4x96xf32> to vector<4x32xf32>
    %267 = vector.extract_strided_slice %264 {offsets = [0, 0], sizes = [4, 32], strides = [1, 1]} : vector<4x128xf32> to vector<4x32xf32>
    %268 = arith.addf %266, %267 : vector<4x32xf32>
    %269 = arith.negf %268 : vector<4x32xf32>
    %270 = math.exp %269 : vector<4x32xf32>
    %cst_68 = arith.constant 1.000000e+00 : f32
    %271 = vector.broadcast %cst_68 : f32 to vector<4x32xf32>
    %272 = arith.addf %271, %270 : vector<4x32xf32>
    %273 = arith.divf %271, %272 : vector<4x32xf32>
    %274 = vector.extract_strided_slice %263 {offsets = [0, 32], sizes = [4, 32], strides = [1, 1]} : vector<4x96xf32> to vector<4x32xf32>
    %275 = vector.extract_strided_slice %264 {offsets = [0, 32], sizes = [4, 32], strides = [1, 1]} : vector<4x128xf32> to vector<4x32xf32>
    %276 = arith.addf %274, %275 : vector<4x32xf32>
    %277 = arith.negf %276 : vector<4x32xf32>
    %278 = math.exp %277 : vector<4x32xf32>
    %cst_69 = arith.constant 1.000000e+00 : f32
    %279 = vector.broadcast %cst_69 : f32 to vector<4x32xf32>
    %280 = arith.addf %279, %278 : vector<4x32xf32>
    %281 = arith.divf %279, %280 : vector<4x32xf32>
    %282 = vector.extract_strided_slice %263 {offsets = [0, 64], sizes = [4, 32], strides = [1, 1]} : vector<4x96xf32> to vector<4x32xf32>
    %283 = vector.extract_strided_slice %264 {offsets = [0, 64], sizes = [4, 32], strides = [1, 1]} : vector<4x128xf32> to vector<4x32xf32>
    %284 = arith.mulf %273, %283 : vector<4x32xf32>
    %285 = arith.addf %282, %284 : vector<4x32xf32>
    %286 = math.tanh %285 : vector<4x32xf32>
    %cst_70 = arith.constant 1.000000e+00 : f32
    %287 = vector.broadcast %cst_70 : f32 to vector<4x32xf32>
    %288 = arith.subf %287, %281 : vector<4x32xf32>
    %289 = arith.mulf %288, %286 : vector<4x32xf32>
    %290 = arith.mulf %281, %259 : vector<4x32xf32>
    %291 = arith.addf %289, %290 : vector<4x32xf32>
    %cst_71 = arith.constant dense<0.000000e+00> : vector<4x96xf32>
    %292 = tpu.matmul %291, %2, %cst_71 {dimension_numbers = #tpu.dot_dimension_numbers<[1], [0], [0], [1], [0, 0, 1, 1], [], []>} : vector<4x32xf32>, vector<32x96xf32>, vector<4x96xf32> -> vector<4x96xf32>
    %293 = vector.extract_strided_slice %292 {offsets = [0, 0], sizes = [4, 32], strides = [1, 1]} : vector<4x96xf32> to vector<4x32xf32>
    %294 = vector.extract_strided_slice %265 {offsets = [0, 0], sizes = [4, 32], strides = [1, 1]} : vector<4x96xf32> to vector<4x32xf32>
    %295 = arith.addf %293, %294 : vector<4x32xf32>
    %296 = arith.negf %295 : vector<4x32xf32>
    %297 = math.exp %296 : vector<4x32xf32>
    %cst_72 = arith.constant 1.000000e+00 : f32
    %298 = vector.broadcast %cst_72 : f32 to vector<4x32xf32>
    %299 = arith.addf %298, %297 : vector<4x32xf32>
    %300 = arith.divf %298, %299 : vector<4x32xf32>
    %301 = vector.extract_strided_slice %292 {offsets = [0, 32], sizes = [4, 32], strides = [1, 1]} : vector<4x96xf32> to vector<4x32xf32>
    %302 = vector.extract_strided_slice %265 {offsets = [0, 32], sizes = [4, 32], strides = [1, 1]} : vector<4x96xf32> to vector<4x32xf32>
    %303 = arith.addf %301, %302 : vector<4x32xf32>
    %304 = arith.negf %303 : vector<4x32xf32>
    %305 = math.exp %304 : vector<4x32xf32>
    %cst_73 = arith.constant 1.000000e+00 : f32
    %306 = vector.broadcast %cst_73 : f32 to vector<4x32xf32>
    %307 = arith.addf %306, %305 : vector<4x32xf32>
    %308 = arith.divf %306, %307 : vector<4x32xf32>
    %309 = vector.extract_strided_slice %292 {offsets = [0, 64], sizes = [4, 32], strides = [1, 1]} : vector<4x96xf32> to vector<4x32xf32>
    %310 = vector.extract_strided_slice %265 {offsets = [0, 64], sizes = [4, 32], strides = [1, 1]} : vector<4x96xf32> to vector<4x32xf32>
    %311 = arith.mulf %300, %310 : vector<4x32xf32>
    %312 = arith.addf %309, %311 : vector<4x32xf32>
    %313 = math.tanh %312 : vector<4x32xf32>
    %cst_74 = arith.constant 1.000000e+00 : f32
    %314 = vector.broadcast %cst_74 : f32 to vector<4x32xf32>
    %315 = arith.subf %314, %308 : vector<4x32xf32>
    %316 = arith.mulf %315, %313 : vector<4x32xf32>
    %317 = arith.mulf %308, %255 : vector<4x32xf32>
    %318 = arith.addf %316, %317 : vector<4x32xf32>
    %319 = vector.extract_strided_slice %264 {offsets = [0, 96], sizes = [4, 32], strides = [1, 1]} : vector<4x128xf32> to vector<4x32xf32>
    %cst_75 = arith.constant dense<0.000000e+00> : vector<4x32xf32>
    %320 = tpu.matmul %318, %3, %cst_75 {dimension_numbers = #tpu.dot_dimension_numbers<[1], [0], [0], [1], [0, 0, 1, 1], [], []>} : vector<4x32xf32>, vector<32x32xf32>, vector<4x32xf32> -> vector<4x32xf32>
    %321 = arith.addf %319, %320 : vector<4x32xf32>
    %322 = math.tanh %321 : vector<4x32xf32>
    %c0_76 = arith.constant 0 : index
    %c4 = arith.constant 4 : index
    %c0_77 = arith.constant 0 : index
    %323 = vector.load %arg9[%c0_76, %c4, %c0_77] : memref<4x6x32xf32, #tpu.memory_space<vmem>>, vector<4x1x32xf32>
    %324 = vector.shape_cast %323 : vector<4x1x32xf32> to vector<4x32xf32>
    %325 = vector.shape_cast %322 : vector<4x32xf32> to vector<4x1x32xf32>
    tpu.vector_store %arg9[%c0_76, %c4, %c0_77], %325 {strides = array<i32>} : memref<4x6x32xf32, #tpu.memory_space<vmem>>, vector<4x1x32xf32>,
    %326 = vector.extract_strided_slice %10 {offsets = [20, 0], sizes = [4, 96], strides = [1, 1]} : vector<24x96xf32> to vector<4x96xf32>
    %cst_78 = arith.constant dense<0.000000e+00> : vector<4x128xf32>
    %327 = tpu.matmul %322, %0, %cst_78 {dimension_numbers = #tpu.dot_dimension_numbers<[1], [0], [0], [1], [0, 0, 1, 1], [], []>} : vector<4x32xf32>, vector<32x128xf32>, vector<4x128xf32> -> vector<4x128xf32>
    %cst_79 = arith.constant dense<0.000000e+00> : vector<4x96xf32>
    %328 = tpu.matmul %318, %1, %cst_79 {dimension_numbers = #tpu.dot_dimension_numbers<[1], [0], [0], [1], [0, 0, 1, 1], [], []>} : vector<4x32xf32>, vector<32x96xf32>, vector<4x96xf32> -> vector<4x96xf32>
    %329 = vector.extract_strided_slice %326 {offsets = [0, 0], sizes = [4, 32], strides = [1, 1]} : vector<4x96xf32> to vector<4x32xf32>
    %330 = vector.extract_strided_slice %327 {offsets = [0, 0], sizes = [4, 32], strides = [1, 1]} : vector<4x128xf32> to vector<4x32xf32>
    %331 = arith.addf %329, %330 : vector<4x32xf32>
    %332 = arith.negf %331 : vector<4x32xf32>
    %333 = math.exp %332 : vector<4x32xf32>
    %cst_80 = arith.constant 1.000000e+00 : f32
    %334 = vector.broadcast %cst_80 : f32 to vector<4x32xf32>
    %335 = arith.addf %334, %333 : vector<4x32xf32>
    %336 = arith.divf %334, %335 : vector<4x32xf32>
    %337 = vector.extract_strided_slice %326 {offsets = [0, 32], sizes = [4, 32], strides = [1, 1]} : vector<4x96xf32> to vector<4x32xf32>
    %338 = vector.extract_strided_slice %327 {offsets = [0, 32], sizes = [4, 32], strides = [1, 1]} : vector<4x128xf32> to vector<4x32xf32>
    %339 = arith.addf %337, %338 : vector<4x32xf32>
    %340 = arith.negf %339 : vector<4x32xf32>
    %341 = math.exp %340 : vector<4x32xf32>
    %cst_81 = arith.constant 1.000000e+00 : f32
    %342 = vector.broadcast %cst_81 : f32 to vector<4x32xf32>
    %343 = arith.addf %342, %341 : vector<4x32xf32>
    %344 = arith.divf %342, %343 : vector<4x32xf32>
    %345 = vector.extract_strided_slice %326 {offsets = [0, 64], sizes = [4, 32], strides = [1, 1]} : vector<4x96xf32> to vector<4x32xf32>
    %346 = vector.extract_strided_slice %327 {offsets = [0, 64], sizes = [4, 32], strides = [1, 1]} : vector<4x128xf32> to vector<4x32xf32>
    %347 = arith.mulf %336, %346 : vector<4x32xf32>
    %348 = arith.addf %345, %347 : vector<4x32xf32>
    %349 = math.tanh %348 : vector<4x32xf32>
    %cst_82 = arith.constant 1.000000e+00 : f32
    %350 = vector.broadcast %cst_82 : f32 to vector<4x32xf32>
    %351 = arith.subf %350, %344 : vector<4x32xf32>
    %352 = arith.mulf %351, %349 : vector<4x32xf32>
    %353 = arith.mulf %344, %322 : vector<4x32xf32>
    %354 = arith.addf %352, %353 : vector<4x32xf32>
    %cst_83 = arith.constant dense<0.000000e+00> : vector<4x96xf32>
    %355 = tpu.matmul %354, %2, %cst_83 {dimension_numbers = #tpu.dot_dimension_numbers<[1], [0], [0], [1], [0, 0, 1, 1], [], []>} : vector<4x32xf32>, vector<32x96xf32>, vector<4x96xf32> -> vector<4x96xf32>
    %356 = vector.extract_strided_slice %355 {offsets = [0, 0], sizes = [4, 32], strides = [1, 1]} : vector<4x96xf32> to vector<4x32xf32>
    %357 = vector.extract_strided_slice %328 {offsets = [0, 0], sizes = [4, 32], strides = [1, 1]} : vector<4x96xf32> to vector<4x32xf32>
    %358 = arith.addf %356, %357 : vector<4x32xf32>
    %359 = arith.negf %358 : vector<4x32xf32>
    %360 = math.exp %359 : vector<4x32xf32>
    %cst_84 = arith.constant 1.000000e+00 : f32
    %361 = vector.broadcast %cst_84 : f32 to vector<4x32xf32>
    %362 = arith.addf %361, %360 : vector<4x32xf32>
    %363 = arith.divf %361, %362 : vector<4x32xf32>
    %364 = vector.extract_strided_slice %355 {offsets = [0, 32], sizes = [4, 32], strides = [1, 1]} : vector<4x96xf32> to vector<4x32xf32>
    %365 = vector.extract_strided_slice %328 {offsets = [0, 32], sizes = [4, 32], strides = [1, 1]} : vector<4x96xf32> to vector<4x32xf32>
    %366 = arith.addf %364, %365 : vector<4x32xf32>
    %367 = arith.negf %366 : vector<4x32xf32>
    %368 = math.exp %367 : vector<4x32xf32>
    %cst_85 = arith.constant 1.000000e+00 : f32
    %369 = vector.broadcast %cst_85 : f32 to vector<4x32xf32>
    %370 = arith.addf %369, %368 : vector<4x32xf32>
    %371 = arith.divf %369, %370 : vector<4x32xf32>
    %372 = vector.extract_strided_slice %355 {offsets = [0, 64], sizes = [4, 32], strides = [1, 1]} : vector<4x96xf32> to vector<4x32xf32>
    %373 = vector.extract_strided_slice %328 {offsets = [0, 64], sizes = [4, 32], strides = [1, 1]} : vector<4x96xf32> to vector<4x32xf32>
    %374 = arith.mulf %363, %373 : vector<4x32xf32>
    %375 = arith.addf %372, %374 : vector<4x32xf32>
    %376 = math.tanh %375 : vector<4x32xf32>
    %cst_86 = arith.constant 1.000000e+00 : f32
    %377 = vector.broadcast %cst_86 : f32 to vector<4x32xf32>
    %378 = arith.subf %377, %371 : vector<4x32xf32>
    %379 = arith.mulf %378, %376 : vector<4x32xf32>
    %380 = arith.mulf %371, %318 : vector<4x32xf32>
    %381 = arith.addf %379, %380 : vector<4x32xf32>
    %382 = vector.extract_strided_slice %327 {offsets = [0, 96], sizes = [4, 32], strides = [1, 1]} : vector<4x128xf32> to vector<4x32xf32>
    %cst_87 = arith.constant dense<0.000000e+00> : vector<4x32xf32>
    %383 = tpu.matmul %381, %3, %cst_87 {dimension_numbers = #tpu.dot_dimension_numbers<[1], [0], [0], [1], [0, 0, 1, 1], [], []>} : vector<4x32xf32>, vector<32x32xf32>, vector<4x32xf32> -> vector<4x32xf32>
    %384 = arith.addf %382, %383 : vector<4x32xf32>
    %385 = math.tanh %384 : vector<4x32xf32>
    %c0_88 = arith.constant 0 : index
    %c5 = arith.constant 5 : index
    %c0_89 = arith.constant 0 : index
    %386 = vector.load %arg9[%c0_88, %c5, %c0_89] : memref<4x6x32xf32, #tpu.memory_space<vmem>>, vector<4x1x32xf32>
    %387 = vector.shape_cast %386 : vector<4x1x32xf32> to vector<4x32xf32>
    %388 = vector.shape_cast %385 : vector<4x32xf32> to vector<4x1x32xf32>
    tpu.vector_store %arg9[%c0_88, %c5, %c0_89], %388 {strides = array<i32>} : memref<4x6x32xf32, #tpu.memory_space<vmem>>, vector<4x1x32xf32>,
    %c0_90 = arith.constant 0 : index
    %c0_91 = arith.constant 0 : index
    %c0_92 = arith.constant 0 : index
    %389 = vector.load %arg9[%c0_90, %c0_91, %c0_92] : memref<4x6x32xf32, #tpu.memory_space<vmem>>, vector<4x6x32xf32>
    %cst_93 = arith.constant dense<0.000000e+00> : vector<4x6xf32>
    %390 = vector.multi_reduction <add>, %389, %cst_93 [2] : vector<4x6x32xf32> to vector<4x6xf32>
    %391 = vector.shape_cast %390 : vector<4x6xf32> to vector<4x6x1xf32>
    %cst_94 = arith.constant 3.200000e+01 : f32
    %392 = vector.broadcast %cst_94 : f32 to vector<4x6x1xf32>
    %393 = arith.divf %391, %392 : vector<4x6x1xf32>
    %394 = vector.broadcast %393 : vector<4x6x1xf32> to vector<4x6x32xf32>
    %395 = arith.subf %389, %394 : vector<4x6x32xf32>
    %396 = arith.mulf %395, %395 : vector<4x6x32xf32>
    %cst_95 = arith.constant dense<0.000000e+00> : vector<4x6xf32>
    %397 = vector.multi_reduction <add>, %396, %cst_95 [2] : vector<4x6x32xf32> to vector<4x6xf32>
    %398 = vector.shape_cast %397 : vector<4x6xf32> to vector<4x6x1xf32>
    %cst_96 = arith.constant 0.0322580636 : f32
    %399 = vector.broadcast %cst_96 : f32 to vector<4x6x1xf32>
    %400 = arith.mulf %398, %399 : vector<4x6x1xf32>
    %401 = math.sqrt %400 : vector<4x6x1xf32>
    %cst_97 = arith.constant 9.99999997E-7 : f32
    %402 = vector.broadcast %cst_97 : f32 to vector<4x6x1xf32>
    %403 = arith.addf %401, %402 : vector<4x6x1xf32>
    %404 = tpu.reciprocal %403 : vector<4x6x1xf32> -> vector<4x6x1xf32>
    %c0_98 = arith.constant 0 : index
    %c0_99 = arith.constant 0 : index
    %c0_100 = arith.constant 0 : index
    %405 = vector.load %arg7[%c0_98, %c0_99, %c0_100] : memref<1x1x32xf32, #tpu.memory_space<vmem>>, vector<1x1x32xf32>
    %406 = vector.broadcast %405 : vector<1x1x32xf32> to vector<4x6x32xf32>
    %407 = arith.mulf %406, %395 : vector<4x6x32xf32>
    %408 = vector.broadcast %404 : vector<4x6x1xf32> to vector<4x6x32xf32>
    %409 = arith.mulf %407, %408 : vector<4x6x32xf32>
    %c0_101 = arith.constant 0 : index
    %c0_102 = arith.constant 0 : index
    %c0_103 = arith.constant 0 : index
    %410 = vector.load %arg8[%c0_101, %c0_102, %c0_103] : memref<1x1x32xf32, #tpu.memory_space<vmem>>, vector<1x1x32xf32>
    %411 = vector.broadcast %410 : vector<1x1x32xf32> to vector<4x6x32xf32>
    %412 = arith.addf %409, %411 : vector<4x6x32xf32>
    %c0_104 = arith.constant 0 : index
    %c0_105 = arith.constant 0 : index
    %c0_106 = arith.constant 0 : index
    %413 = vector.load %arg9[%c0_104, %c0_105, %c0_106] : memref<4x6x32xf32, #tpu.memory_space<vmem>>, vector<4x6x32xf32>
    tpu.vector_store %arg9[%c0_104, %c0_105, %c0_106], %412 {strides = array<i32>} : memref<4x6x32xf32, #tpu.memory_space<vmem>>, vector<4x6x32xf32>,
    return
  }
}

</mosaic_0001>

<bundles_post_ra>
// kernel: tpu_custom_call.1
= control target key start
LH: loop header
LB: loop body
LE: loop exit
PB: predicated region body
PF: predicated region fallthrough
CT: control target
= control target key end

     0   :  { %14 = vsyncpa [#allocation3], 0  ;;  %s4391_s0 = inlined_call_operand.hbm [shape: f32[24,32], index: 0, kind: input, shape index: {}]   ;;  %s4392_s1 = inlined_call_operand.hbm [shape: f32[2,4,32], index: 1, kind: input, shape index: {}]   ;;  %s4393_s2 = inlined_call_operand.hbm [shape: f32[32,96], index: 2, kind: input, shape index: {}]   ;;  %s4394_s3 = inlined_call_operand.hbm [shape: f32[32,128], index: 3, kind: input, shape index: {}]   ;;  %s4395_s4 = inlined_call_operand.hbm [shape: f32[32,96], index: 4, kind: input, shape index: {}]   ;;  %s4396_s5 = inlined_call_operand.hbm [shape: f32[32,96], index: 5, kind: input, shape index: {}]   ;;  %s4397_s6 = inlined_call_operand.hbm [shape: f32[32,32], index: 6, kind: input, shape index: {}]   ;;  %s4398_s7 = inlined_call_operand.vmem [shape: f32[1,1,32], index: 7, kind: input, shape index: {}]   ;;  %s4399_s8 = inlined_call_operand.vmem [shape: f32[1,1,32], index: 8, kind: input, shape index: {}]   ;;  %s4400_s9 = inlined_call_operand.vmem [shape: f32[4,6,32], index: 9, kind: output, shape index: {}]  }
   0x1   :  { %15 = vsyncpa [#allocation5], 0 }
   0x2   :  { %16 = vsyncpa [#allocation8], 0 }
   0x3   :  { %17 = vsyncpa [#allocation11], 0  ;;  %s3578_s30 = smov [#allocation4]  }
   0x4   :  { %s35_s10 = sshll.u32 %s3578_s30, 4  ;;  %s36_s10 = int_to_ptr.vmem [resolvable:$true] %s35_s10 }
   0x5   :  { %s3438_s11 = scalar_lea.vmem %s36_s10, 128  ;;  %p3443_p1 = scmp.lt.s32.totalorder %s36_s10, %s36_s10 }
   0x6   :  { %p3439_p0 = scmp.ne.s32.totalorder %s36_s10, %s3438_s11  ;;  %p3444_p2 = scmp.lt.s32.totalorder %s3438_s11, %s3438_s11 }
   0x8   :  { %p3445_p3 = por %p3444_p2, %p3443_p1 }
   0xa   :  { %p3446_p4 = pnand %p3445_p3, %p3439_p0 }
   0xc   :  { %3449 = shalt.err (!%p3446_p4)
}
   0xd   :  { %s3579_s12 = smov 64   ;;  %s3580_s13 = smov 4  }
   0xe   :  { %41 = dma.hbm_to_vmem [thread:$0]  %s4392_s1, 128, %s36_s10, [#allocation5], %s3579_s12, %s3579_s12, %s3580_s13  }
   0xf   :  { %s3581_s16 = smov [#allocation7]   ;;  %s3582_s18 = smov [#allocation10]  }
  0x10   :  { %s59_s17 = sshll.u32 %s3581_s16, 4  ;;  %s83_s19 = sshll.u32 %s3582_s18, 4  ;;  %s60_s17 = int_to_ptr.vmem [resolvable:$true] %s59_s17  ;;  %s84_s19 = int_to_ptr.vmem [resolvable:$true] %s83_s19 }
  0x11   :  { %s3458_s20 = scalar_lea.vmem %s60_s17, 512  ;;  %p3463_p6 = scmp.lt.s32.totalorder %s60_s17, %s60_s17 }
  0x12   :  { %p3459_p5 = scmp.ne.s32.totalorder %s60_s17, %s3458_s20  ;;  %p3464_p7 = scmp.lt.s32.totalorder %s3458_s20, %s3458_s20 }
  0x14   :  { %p3465_p8 = por %p3464_p7, %p3463_p6 }
  0x16   :  { %p3466_p9 = pnand %p3465_p8, %p3459_p5 }
  0x18   :  { %3469 = shalt.err (!%p3466_p9)
}
  0x19   :  { %s3583_s21 = smov 128   ;;  %s3584_s22 = smov 8  }
  0x1a   :  { %65 = dma.hbm_to_vmem [thread:$0]  %s4394_s3, 512, %s60_s17, [#allocation8], %s3583_s21, %s3583_s21, %s3584_s22  }
  0x1b   :  { %s3478_s1 = scalar_lea.vmem %s84_s19, 512  ;;  %p3483_p11 = scmp.lt.s32.totalorder %s84_s19, %s84_s19 }
  0x1c   :  { %p3479_p10 = scmp.ne.s32.totalorder %s84_s19, %s3478_s1  ;;  %p3484_p12 = scmp.lt.s32.totalorder %s3478_s1, %s3478_s1 }
  0x1e   :  { %p3485_p13 = por %p3484_p12, %p3483_p11 }
  0x20   :  { %p3486_p0 = pnand %p3485_p13, %p3479_p10 }
  0x22   :  { %3489 = shalt.err (!%p3486_p0)
}
  0x23   :  { %89 = dma.hbm_to_vmem [thread:$0]  %s4396_s5, 512, %s84_s19, [#allocation11], %s3583_s21, %s3583_s21, %s3584_s22  }
  0x24   :  { %s3585_s27 = smov [#allocation2]   ;;  %s3586_s29 = smov [#allocation6]  }
  0x25   :  { %s23_s28 = sshll.u32 %s3585_s27, 4  ;;  %s47_s3 = sshll.u32 %s3586_s29, 4  ;;  %s24_s28 = int_to_ptr.vmem [resolvable:$true] %s23_s28  ;;  %s48_s3 = int_to_ptr.vmem [resolvable:$true] %s47_s3 }
  0x26   :  { %s3498_s30 = scalar_lea.vmem %s24_s28, 384  ;;  %p3503_p2 = scmp.lt.s32.totalorder %s24_s28, %s24_s28 }
  0x27   :  { %p3499_p1 = scmp.ne.s32.totalorder %s24_s28, %s3498_s30  ;;  %p3504_p3 = scmp.lt.s32.totalorder %s3498_s30, %s3498_s30 }
  0x29   :  { %p3505_p4 = por %p3504_p3, %p3503_p2 }
  0x2b   :  { %p3506_p5 = pnand %p3505_p4, %p3499_p1 }
  0x2d   :  { %3509 = shalt.err (!%p3506_p5)
}
  0x2e   :  { %29 = dma.hbm_to_vmem [thread:$0]  %s4391_s0, 384, %s24_s28, [#allocation3], %s3583_s21, %s3583_s21, %s3584_s22  }
  0x2f   :  { %s3518_s5 = scalar_lea.vmem %s48_s3, 512  ;;  %p3523_p7 = scmp.lt.s32.totalorder %s48_s3, %s48_s3 }
  0x30   :  { %p3519_p6 = scmp.ne.s32.totalorder %s48_s3, %s3518_s5  ;;  %p3524_p8 = scmp.lt.s32.totalorder %s3518_s5, %s3518_s5 }
  0x32   :  { %p3525_p9 = por %p3524_p8, %p3523_p7 }
  0x34   :  { %p3526_p10 = pnand %p3525_p9, %p3519_p6 }
  0x36   :  { %3529 = shalt.err (!%p3526_p10)
}
  0x37   :  { %53 = dma.hbm_to_vmem [thread:$0]  %s4393_s2, 512, %s48_s3, [#allocation5], %s3583_s21, %s3583_s21, %s3584_s22  }
  0x38   :  { %s3587_s15 = smov [#allocation9]   ;;  %s3588_s17 = smov [#allocation12]  }
  0x39   :  { %s71_s16 = sshll.u32 %s3587_s15, 4  ;;  %s95_s0 = sshll.u32 %s3588_s17, 4  ;;  %s72_s16 = int_to_ptr.vmem [resolvable:$true] %s71_s16  ;;  %s96_s0 = int_to_ptr.vmem [resolvable:$true] %s95_s0 }
  0x3a   :  { %s3538_s18 = scalar_lea.vmem %s72_s16, 512  ;;  %p3543_p12 = scmp.lt.s32.totalorder %s72_s16, %s72_s16 }
  0x3b   :  { %p3539_p11 = scmp.ne.s32.totalorder %s72_s16, %s3538_s18  ;;  %p3544_p13 = scmp.lt.s32.totalorder %s3538_s18, %s3538_s18 }
  0x3d   :  { %p3545_p0 = por %p3544_p13, %p3543_p12 }
  0x3f   :  { %p3546_p1 = pnand %p3545_p0, %p3539_p11 }
  0x41   :  { %3549 = shalt.err (!%p3546_p1)
}
  0x42   :  { %77 = dma.hbm_to_vmem [thread:$0]  %s4395_s4, 512, %s72_s16, [#allocation8], %s3583_s21, %s3583_s21, %s3584_s22  }
  0x43   :  { %s3558_s2 = scalar_lea.vmem %s96_s0, 512  ;;  %p3563_p3 = scmp.lt.s32.totalorder %s96_s0, %s96_s0 }
  0x44   :  { %p3559_p2 = scmp.ne.s32.totalorder %s96_s0, %s3558_s2  ;;  %p3564_p4 = scmp.lt.s32.totalorder %s3558_s2, %s3558_s2 }
  0x46   :  { %p3565_p5 = por %p3564_p4, %p3563_p3 }
  0x48   :  { %p3566_p6 = pnand %p3565_p5, %p3559_p2 }
  0x4a   :  { %3569 = shalt.err (!%p3566_p6)
}
  0x4b   :  { %101 = dma.hbm_to_vmem [thread:$0]  %s4397_s6, 512, %s96_s0, [#allocation11], %s3583_s21, %s3583_s21, %s3584_s22  }
  0x4c   :  { %3570 = dma.done.wait [#allocation3], 384  }
  0x4d   :  { %3571 = vsyncadd [#allocation3], 4294966912 }
  0x4e   :  { %3572 = dma.done.wait [#allocation5], 640  }
  0x4f   :  { %3573 = vsyncadd [#allocation5], 4294966656 }
  0x50   :  { %3574 = dma.done.wait [#allocation8], 1024  }
  0x51   :  { %3575 = vsyncadd [#allocation8], 4294966272 }
  0x52   :  { %3576 = dma.done.wait [#allocation11], 1024  }
  0x53   :  { %3577 = vsyncadd [#allocation11], 4294966272  ;;  %v3589_v0 = vmov 0.0   ;;  %vm3590_vm0 = vmmov 0   ;;  %v152_v1 = vld [vmem:[#allocation6 + $0x18] sm:$0xff]  ;;  %v151_v3 = vld [vmem:[#allocation6 + $0x10] sm:$0xff] }
  0x54   :  { %3021 = vmatprep.subr.mxu0 %v3589_v0  ;;  %3038 = vmatprep.subr.mxu1 %v3589_v0  ;;  %v3691_v2 = vld [vmem:[#allocation7 + $0x18] sm:$0xff]  ;;  %v3694_v4 = vld [vmem:[#allocation7 + $0x10] sm:$0xff]  ;;  %v150_v5 = vld [vmem:[#allocation6 + $0x8] sm:$0xff]  ;;  %vm153_vm1 = vcmask 261120   ;;  %s3591_s4 = smov 96   ;;  %s3592_s6 = smov 32  }
  0x55   :  { %3029 = vmatprep.mubr.msk.f32.mxu0 %vm3590_vm0, %v3589_v0  ;;  %3046 = vmatprep.mubr.msk.f32.mxu1 %vm3590_vm0, %v3589_v0  ;;  %v3698_v6 = vld [vmem:[#allocation7 + $0x8] sm:$0xff]  ;;  %v149_v7 = vld [vmem:[#allocation6] sm:$0xff]  ;;  %v143_v10 = vld [vmem:[#allocation4] sm:$0xf]  ;;  %vm656_vm2 = vcmask 253952   ;;  %vm2737_vm3 = vcmask 259072  }
  0x56   :  { %3022 = vmatpush3.msra.mxu0 %v152_v1  ;;  %3039 = vmatpush3.msra.mxu1 %v3691_v2  ;;  %v3703_v8 = vld [vmem:[#allocation7] sm:$0xff]  ;;  %v3727_v24 = vld [vmem:[#allocation10 + $0x18] sm:$0xff]  ;;  %v3729_v25 = vld [vmem:[#allocation10 + $0x10] sm:$0xff] }
  0x57   :  { %3023 = vmatprep.subr.mxu0 %v3589_v0  ;;  %3040 = vmatprep.subr.mxu1 %v3589_v0  ;;  %v146_v9 = vld [vmem:[#allocation2] sm:$0xff]  ;;  %v3732_v26 = vld [vmem:[#allocation9 + $0x18] sm:$0xff]  ;;  %v3735_v27 = vld [vmem:[#allocation10 + $0x8] sm:$0xff] }
  0x58   :  { %3024 = vmatpush3.msra.mxu0 %v151_v3  ;;  %3041 = vmatpush3.msra.mxu1 %v3694_v4  ;;  %v147_v28 = vld [vmem:[#allocation2 + $0x8] sm:$0xff]  ;;  %v3740_v29 = vld [vmem:[#allocation9 + $0x10] sm:$0xff]  ;;  %v3743_v31 = vld [vmem:[#allocation10] sm:$0xff] }
  0x59   :  { %3025 = vmatprep.subr.mxu0 %v3589_v0  ;;  %3042 = vmatprep.subr.mxu1 %v3589_v0  ;;  %v145_v32 = vld [vmem:[#allocation4 + $0x4] sm:$0xf]  ;;  %v148_v33 = vld [vmem:[#allocation2 + $0x10] sm:$0xff]  ;;  %v3753_v34 = vld [vmem:[#allocation9 + $0x8] sm:$0xff] }
  0x5a   :  { %3026 = vmatpush3.msra.mxu0 %v150_v5  ;;  %3043 = vmatpush3.msra.mxu1 %v3698_v6  ;;  %v3759_v35 = vld [vmem:[#allocation9] sm:$0xff]  ;;  %v3789_v60 = vld [vmem:[#allocation12 + $0x18] sm:$0xff]  ;;  %v3791_v61 = vld [vmem:[#allocation12 + $0x10] sm:$0xff] }
  0x5b   :  { %3027 = vmatprep.subr.mxu0 %v3589_v0  ;;  %3044 = vmatprep.subr.mxu1 %v3589_v0  ;;  %v3795_v62 = vld [vmem:[#allocation12 + $0x8] sm:$0xff]  ;;  %v3799_v63 = vld [vmem:[#allocation12] sm:$0xff] }
  0x5c   :  { %3028 = vmatpush3.msra.mxu0 %v149_v7  ;;  %3045 = vmatpush3.msra.mxu1 %v3703_v8 }
  0x5d   :  { %3030 = vmatmul.mubr.msk.f32.vlgmr.msra.gmra.mxu0 %vm153_vm1, %v146_v9  ;;  %3047 = vmatmul.mubr.msk.f32.vlgmr.msra.gmra.mxu1 %vm153_vm1, %v143_v10 }
  0x5e   :  { %3049 = vmatprep.subr.mxu1 %v3589_v0  ;;  %3057 = vmatprep.mubr.msk.f32.mxu1 %vm3590_vm0, %v3589_v0 }
  0x5f   :  { %3060 = vmatprep.subr.mxu0 %v3589_v0  ;;  %3032 = vmatprep.mubr.msk.f32.mxu0 %vm3590_vm0, %v3589_v0 }
  0x60   :  { %3050 = vmatpush3.msra.mxu1 %v3727_v24  ;;  %3061 = vmatpush3.msra.mxu0 %v3732_v26 }
  0x61   :  { %3051 = vmatprep.subr.mxu1 %v3589_v0  ;;  %3033 = vmatmul.mubr.msk.f32.gmra.mxu0 %vm153_vm1, %v147_v28 }
  0x62   :  { %3052 = vmatpush3.msra.mxu1 %v3729_v25  ;;  %3062 = vmatprep.subr.mxu0 %v3589_v0 }
  0x63   :  { %3053 = vmatprep.subr.mxu1 %v3589_v0  ;;  %3063 = vmatpush3.msra.mxu0 %v3740_v29 }
  0x64   :  { %3054 = vmatpush3.msra.mxu1 %v3735_v27  ;;  %3035 = vmatprep.mubr.msk.f32.mxu0 %vm3590_vm0, %v3589_v0 }
  0x65   :  { %3055 = vmatprep.subr.mxu1 %v3589_v0  ;;  %3064 = vmatprep.subr.mxu0 %v3589_v0 }
  0x66   :  { %3056 = vmatpush3.msra.mxu1 %v3743_v31  ;;  %3036 = vmatmul.mubr.msk.f32.gmra.mxu0 %vm153_vm1, %v148_v33 }
  0x67   :  { %3058 = vmatmul.mubr.msk.f32.vlgmr.msra.gmra.mxu1 %vm153_vm1, %v145_v32  ;;  %3065 = vmatpush3.msra.mxu0 %v3753_v34 }
  0x68   :  { %3068 = vmatprep.mubr.msk.f32.mxu0 %vm3590_vm0, %v3589_v0  ;;  %3066 = vmatprep.subr.mxu0 %v3589_v0 }
  0x69   :  { %3071 = vmatprep.subr.mxu1 %v3589_v0  ;;  %3067 = vmatpush3.msra.mxu0 %v3759_v35 }
  0x6a   :  { %3079 = vmatprep.mubr.msk.f32.mxu1 %vm3590_vm0, %v3589_v0  ;;  %3082 = vmatprep.subr.mxu0 %v3589_v0 }
  0x6b   :  { %3072 = vmatpush3.msra.mxu1 %v3789_v60 }
  0x6c   :  { %3073 = vmatprep.subr.mxu1 %v3589_v0 }
  0x6d   :  { %3074 = vmatpush3.msra.mxu1 %v3791_v61 }
  0x6e   :  { %3075 = vmatprep.subr.mxu1 %v3589_v0 }
  0x6f   :  { %3076 = vmatpush3.msra.mxu1 %v3795_v62 }
  0x70   :  { %3077 = vmatprep.subr.mxu1 %v3589_v0 }
  0x71   :  { %3078 = vmatpush3.msra.mxu1 %v3799_v63 }
  0x72   :  { %3093 = vmatprep.subr.mxu1 %v3589_v0 }
 0x11d   :  { %v3717_v11 = vpop.f32.mrf.mxu0  ;;  %v3719_v12 = vpop.f32.mrf.mxu1 }
 0x11e   :  { %397 = vrot.lane.b32.xlu0 %v3719_v12, %s3579_s12  ;;  %v389_v15 = vadd.f32 %v3719_v12, %v3717_v11 }
 0x11f   :  { %v3048_v13 = vpop.f32.mrf.mxu1  ;;  %v3031_v14 = vpop.f32.mrf.mxu0 }
 0x120   :  { %v2858_v16 = vmul.f32 -1.442695, %v389_v15 }
 0x121   :  { %v3771_v42 = vpop.f32.mrf.mxu0 }
 0x122   :  { %3318 = vpow2.f32 %v2858_v16 }
 0x123   :  { %v3034_v43 = vpop.f32.mrf.mxu0 }
 0x126   :  { %v3774_v45 = vpop.f32.mrf.mxu0 }
 0x127   :  { %v385_v44 = vpop.f32.mrf.mxu1 }
 0x128   :  { %v3037_v47 = vpop.f32.mrf.mxu0 }
 0x129   :  { %v3059_v46 = vpop.f32.mrf.mxu1 }
 0x12f   :  { %v3319_v17 = vpop.eup %3318 }
 0x130   :  { %v393_v18 = vadd.f32 1.0, %v3319_v17 }
 0x132   :  { %3320 = vrcp.f32 %v393_v18 }
 0x13f   :  { %v3321_v19 = vpop.eup %3320 }
 0x140   :  { %v407_v37 = vsub.f32 1.0, %v3321_v19 }
 0x190   :  { %v398_v20 = vpop.permute.xlu0 %397 }
 0x191   :  { %v400_v21 = vmul.f32 %v3321_v19, %v398_v20 }
 0x193   :  { %402 = vrot.lane.b32.xlu0 %v400_v21, %s3579_s12 }
 0x205   :  { %v403_v22 = vpop.permute.xlu0 %402 }
 0x206   :  { %v405_v23 = vadd.f32 %v403_v22, %v3717_v11 }
 0x208   :  { %3322 = vtanh.f32 %v405_v23 }
 0x215   :  { %v3323_v30 = vpop.eup %3322 }
 0x216   :  { %409 = vrot.lane.b32.xlu1 %v3323_v30, %s3591_s4 }
 0x21a   :  { %413 = vrot.lane.b32.xlu1 %v143_v10, %s3592_s6 }
 0x21e   :  { %501 = vrot.lane.b32.xlu1 %v385_v44, %s3579_s12 }
 0x288   :  { %v410_v36 = vpop.permute.xlu1 %409 }
 0x289   :  { %v412_v39 = vmul.f32 %v410_v36, %v407_v37 }
 0x28c   :  { %v414_v38 = vpop.permute.xlu1 %413 }
 0x28d   :  { %v416_v40 = vmul.f32 %v3321_v19, %v414_v38 }
 0x28f   :  { %v417_v41 = vadd.f32 %v416_v40, %v412_v39 }
 0x290   :  { %v502_v55 = vpop.permute.xlu1 %501 }
 0x291   :  { %419 = vrot.lane.b32.xlu0 %v417_v41, %s3591_s4 }
 0x303   :  { %v420_v48 = vpop.permute.xlu0 %419 }
 0x304   :  { %3069 = vmatmul.mubr.msk.f32.vlgmr.msra.gmra.mxu0 %vm153_vm1, %v420_v48 }
 0x305   :  { %3083 = vmatpush3.msra.mxu0 %v3691_v2  ;;  %3090 = vmatprep.mubr.msk.f32.mxu0 %vm3590_vm0, %v3589_v0 }
 0x306   :  { %3084 = vmatprep.subr.mxu0 %v3589_v0 }
 0x307   :  { %3085 = vmatpush3.msra.mxu0 %v3694_v4 }
 0x308   :  { %3086 = vmatprep.subr.mxu0 %v3589_v0 }
 0x309   :  { %3087 = vmatpush3.msra.mxu0 %v3698_v6 }
 0x30a   :  { %3088 = vmatprep.subr.mxu0 %v3589_v0 }
 0x30b   :  { %3089 = vmatpush3.msra.mxu0 %v3703_v8 }
 0x30c   :  { %3104 = vmatprep.subr.mxu0 %v3589_v0 }
 0x3c4   :  { %v489_v49 = vpop.f32.mrf.mxu0 }
 0x3c5   :  { %v493_v50 = vadd.f32 %v489_v49, %v385_v44 }
 0x3c6   :  { %v3070_v51 = vpop.f32.mrf.mxu0 }
 0x3c7   :  { %v2860_v52 = vmul.f32 -1.442695, %v493_v50 }
 0x3c9   :  { %3324 = vpow2.f32 %v2860_v52 }
 0x3d6   :  { %v3325_v53 = vpop.eup %3324 }
 0x3d7   :  { %v497_v54 = vadd.f32 1.0, %v3325_v53 }
 0x3d9   :  { %3326 = vrcp.f32 %v497_v54 }
 0x3e6   :  { %v3327_v56 = vpop.eup %3326 }
 0x3e7   :  { %v504_v57 = vmul.f32 %v3327_v56, %v502_v55  ;;  %v511_v5 = vsub.f32 1.0, %v3327_v56 }
 0x3e9   :  { %506 = vrot.lane.b32.xlu0 %v504_v57, %s3579_s12 }
 0x3ed   :  { %517 = vrot.lane.b32.xlu0 %v145_v32, %s3592_s6 }
 0x45b   :  { %v507_v58 = vpop.permute.xlu0 %506 }
 0x45c   :  { %v509_v59 = vadd.f32 %v507_v58, %v489_v49 }
 0x45e   :  { %3328 = vtanh.f32 %v509_v59 }
 0x45f   :  { %v518_v3 = vpop.permute.xlu0 %517 }
 0x460   :  { %v520_v9 = vmul.f32 %v3327_v56, %v518_v3 }
 0x46b   :  { %v3329_v1 = vpop.eup %3328 }
 0x46c   :  { %513 = vrot.lane.b32.xlu1 %v3329_v1, %s3591_s4 }
 0x4de   :  { %v514_v7 = vpop.permute.xlu1 %513 }
 0x4df   :  { %v516_v10 = vmul.f32 %v514_v7, %v511_v5 }
 0x4e1   :  { %v3806_v13 = vadd.f32 %v520_v9, %v516_v10 }
 0x4e3   :  { %523 = vrot.lane.b32.xlu1 %v3806_v13, %s3591_s4 }
 0x555   :  { %v524_v14 = vpop.permute.xlu1 %523 }
 0x556   :  { %3080 = vmatmul.mubr.msk.f32.vlgmr.msra.gmra.mxu1 %vm153_vm1, %v524_v14 }
 0x557   :  { %3094 = vmatpush3.msra.mxu1 %v3727_v24  ;;  %3101 = vmatprep.mubr.msk.f32.mxu1 %vm3590_vm0, %v3589_v0 }
 0x558   :  { %3095 = vmatprep.subr.mxu1 %v3589_v0 }
 0x559   :  { %3096 = vmatpush3.msra.mxu1 %v3729_v25 }
 0x55a   :  { %3097 = vmatprep.subr.mxu1 %v3589_v0 }
 0x55b   :  { %3098 = vmatpush3.msra.mxu1 %v3735_v27 }
 0x55c   :  { %3099 = vmatprep.subr.mxu1 %v3589_v0 }
 0x55d   :  { %3100 = vmatpush3.msra.mxu1 %v3743_v31 }
 0x55e   :  { %3102 = vmatmul.mubr.msk.f32.vlgmr.msra.gmra.mxu1 %vm153_vm1, %v524_v14  ;;  %3115 = vmatprep.subr.mxu1 %v3589_v0 }
 0x55f   :  { %3116 = vmatpush3.msra.mxu1 %v3789_v60  ;;  %3123 = vmatprep.mubr.msk.f32.mxu1 %vm3590_vm0, %v3589_v0 }
 0x560   :  { %3117 = vmatprep.subr.mxu1 %v3589_v0 }
 0x561   :  { %3118 = vmatpush3.msra.mxu1 %v3791_v61 }
 0x562   :  { %3119 = vmatprep.subr.mxu1 %v3589_v0 }
 0x563   :  { %3120 = vmatpush3.msra.mxu1 %v3795_v62 }
 0x564   :  { %3121 = vmatprep.subr.mxu1 %v3589_v0 }
 0x565   :  { %3122 = vmatpush3.msra.mxu1 %v3799_v63 }
 0x566   :  { %3137 = vmatprep.subr.mxu1 %v3589_v0 }
 0x616   :  { %v593_v15 = vpop.f32.mrf.mxu1 }
 0x617   :  { %598 = vrot.lane.b32.xlu0 %v593_v15, %s3591_s4 }
 0x618   :  { %v3081_v16 = vpop.f32.mrf.mxu1 }
 0x61e   :  { %v801_v17 = vpop.f32.mrf.mxu1 }
 0x620   :  { %v3103_v18 = vpop.f32.mrf.mxu1 }
 0x689   :  { %v599_v19 = vpop.permute.xlu0 %598 }
 0x68a   :  { %v601_v20 = vadd.f32 %v599_v19, %v3719_v12 }
 0x68c   :  { %3330 = vtanh.f32 %v601_v20 }
 0x699   :  { %v3834_v21 = vpop.eup %3330 }
 0x69a   :  { %661 = vrot.lane.b32.xlu1 %v3834_v21, %s3592_s6  ;;  %v831_v40 = vrot.slane %v3834_v21, 4 }
 0x70c   :  { %v662_v22 = vpop.permute.xlu1 %661 }
 0x70d   :  { %3091 = vmatmul.mubr.msk.f32.vlgmr.msra.gmra.mxu0 %vm153_vm1, %v662_v22 }
 0x70e   :  { %3105 = vmatpush3.msra.mxu0 %v3732_v26  ;;  %3112 = vmatprep.mubr.msk.f32.mxu0 %vm3590_vm0, %v3589_v0 }
 0x70f   :  { %3106 = vmatprep.subr.mxu0 %v3589_v0 }
 0x710   :  { %3107 = vmatpush3.msra.mxu0 %v3740_v29 }
 0x711   :  { %3108 = vmatprep.subr.mxu0 %v3589_v0 }
 0x712   :  { %3109 = vmatpush3.msra.mxu0 %v3753_v34 }
 0x713   :  { %3110 = vmatprep.subr.mxu0 %v3589_v0 }
 0x714   :  { %3111 = vmatpush3.msra.mxu0 %v3759_v35 }
 0x715   :  { %3126 = vmatprep.subr.mxu0 %v3589_v0 }
 0x7cd   :  { %v3849_v12 = vpop.f32.mrf.mxu0 }
 0x7ce   :  { %v806_v23 = vrot.slane %v3849_v12, 4 }
 0x7cf   :  { %v3092_v28 = vpop.f32.mrf.mxu0 }
 0x7d0   :  { %815 = vrot.lane.b32.xlu0 %v806_v23, %s3579_s12  ;;  %v808_v30 = vadd.f32 %v806_v23, %v3717_v11 }
 0x7d2   :  { %v2864_v32 = vmul.f32 -1.442695, %v808_v30 }
 0x7d4   :  { %3332 = vpow2.f32 %v2864_v32 }
 0x7e1   :  { %v3333_v33 = vpop.eup %3332 }
 0x7e2   :  { %v812_v36 = vadd.f32 1.0, %v3333_v33 }
 0x7e4   :  { %3334 = vrcp.f32 %v812_v36 }
 0x7f1   :  { %v3335_v37 = vpop.eup %3334 }
 0x7f2   :  { %v825_v47 = vsub.f32 1.0, %v3335_v37 }
 0x842   :  { %v816_v38 = vpop.permute.xlu0 %815 }
 0x843   :  { %v818_v39 = vmul.f32 %v3335_v37, %v816_v38 }
 0x845   :  { %820 = vrot.lane.b32.xlu1 %v818_v39, %s3579_s12 }
 0x849   :  { %832 = vrot.lane.b32.xlu1 %v831_v40, %s3579_s12 }
 0x84d   :  { %921 = vrot.lane.b32.xlu1 %v801_v17, %s3579_s12 }
 0x8b7   :  { %v821_v41 = vpop.permute.xlu1 %820 }
 0x8b8   :  { %v823_v43 = vadd.f32 %v821_v41, %v3717_v11 }
 0x8ba   :  { %3336 = vtanh.f32 %v823_v43 }
 0x8bb   :  { %v833_v46 = vpop.permute.xlu1 %832 }
 0x8bc   :  { %v835_v49 = vmul.f32 %v3335_v37, %v833_v46 }
 0x8bf   :  { %v922_v1 = vpop.permute.xlu1 %921 }
 0x8c7   :  { %v3337_v44 = vpop.eup %3336 }
 0x8c8   :  { %827 = vrot.lane.b32.xlu0 %v3337_v44, %s3591_s4 }
 0x93a   :  { %v828_v48 = vpop.permute.xlu0 %827 }
 0x93b   :  { %v830_v50 = vmul.f32 %v828_v48, %v825_v47 }
 0x93d   :  { %v836_v51 = vadd.f32 %v835_v49, %v830_v50 }
 0x93f   :  { %v838_v52 = vrot.slane %v836_v51, 4 }
 0x941   :  { %839 = vrot.lane.b32.xlu0 %v838_v52, %s3591_s4 }
 0x9b3   :  { %v840_v53 = vpop.permute.xlu0 %839 }
 0x9b4   :  { %3113 = vmatmul.mubr.msk.f32.vlgmr.msra.gmra.mxu0 %vm153_vm1, %v840_v53 }
 0x9b5   :  { %3127 = vmatpush3.msra.mxu0 %v3691_v2  ;;  %3134 = vmatprep.mubr.msk.f32.mxu0 %vm3590_vm0, %v3589_v0 }
 0x9b6   :  { %3128 = vmatprep.subr.mxu0 %v3589_v0 }
 0x9b7   :  { %3129 = vmatpush3.msra.mxu0 %v3694_v4 }
 0x9b8   :  { %3130 = vmatprep.subr.mxu0 %v3589_v0 }
 0x9b9   :  { %3131 = vmatpush3.msra.mxu0 %v3698_v6 }
 0x9ba   :  { %3132 = vmatprep.subr.mxu0 %v3589_v0 }
 0x9bb   :  { %3133 = vmatpush3.msra.mxu0 %v3703_v8 }
 0x9bc   :  { %3148 = vmatprep.subr.mxu0 %v3589_v0 }
 0xa74   :  { %v909_v11 = vpop.f32.mrf.mxu0 }
 0xa75   :  { %v913_v54 = vadd.f32 %v909_v11, %v801_v17 }
 0xa76   :  { %v3114_v55 = vpop.f32.mrf.mxu0 }
 0xa77   :  { %v2866_v56 = vmul.f32 -1.442695, %v913_v54 }
 0xa79   :  { %3338 = vpow2.f32 %v2866_v56 }
 0xa86   :  { %v3339_v57 = vpop.eup %3338 }
 0xa87   :  { %v917_v58 = vadd.f32 1.0, %v3339_v57 }
 0xa89   :  { %3340 = vrcp.f32 %v917_v58 }
 0xa96   :  { %v3341_v59 = vpop.eup %3340 }
 0xa97   :  { %v924_v3 = vmul.f32 %v3341_v59, %v922_v1  ;;  %v931_v10 = vsub.f32 1.0, %v3341_v59  ;;  %v937_v15 = vmul.f32 %v3341_v59, %v3806_v13 }
 0xa99   :  { %926 = vrot.lane.b32.xlu0 %v924_v3, %s3579_s12 }
 0xb0b   :  { %v927_v5 = vpop.permute.xlu0 %926 }
 0xb0c   :  { %v929_v7 = vadd.f32 %v927_v5, %v909_v11 }
 0xb0e   :  { %3342 = vtanh.f32 %v929_v7 }
 0xb1b   :  { %v3343_v9 = vpop.eup %3342 }
 0xb1c   :  { %933 = vrot.lane.b32.xlu1 %v3343_v9, %s3591_s4 }
 0xb8e   :  { %v934_v14 = vpop.permute.xlu1 %933 }
 0xb8f   :  { %v936_v16 = vmul.f32 %v934_v14, %v931_v10 }
 0xb91   :  { %v3875_v17 = vadd.f32 %v937_v15, %v936_v16 }
 0xb93   :  { %940 = vrot.lane.b32.xlu0 %v3875_v17, %s3591_s4 }
 0xc05   :  { %v941_v18 = vpop.permute.xlu0 %940 }
 0xc06   :  { %3124 = vmatmul.mubr.msk.f32.vlgmr.msra.gmra.mxu1 %vm153_vm1, %v941_v18 }
 0xc07   :  { %3138 = vmatpush3.msra.mxu1 %v3727_v24  ;;  %3145 = vmatprep.mubr.msk.f32.mxu1 %vm3590_vm0, %v3589_v0 }
 0xc08   :  { %3139 = vmatprep.subr.mxu1 %v3589_v0 }
 0xc09   :  { %3140 = vmatpush3.msra.mxu1 %v3729_v25 }
 0xc0a   :  { %3141 = vmatprep.subr.mxu1 %v3589_v0 }
 0xc0b   :  { %3142 = vmatpush3.msra.mxu1 %v3735_v27 }
 0xc0c   :  { %3143 = vmatprep.subr.mxu1 %v3589_v0 }
 0xc0d   :  { %3144 = vmatpush3.msra.mxu1 %v3743_v31 }
 0xc0e   :  { %3146 = vmatmul.mubr.msk.f32.vlgmr.msra.gmra.mxu1 %vm153_vm1, %v941_v18  ;;  %3159 = vmatprep.subr.mxu1 %v3589_v0 }
 0xc0f   :  { %3160 = vmatpush3.msra.mxu1 %v3789_v60  ;;  %3167 = vmatprep.mubr.msk.f32.mxu1 %vm3590_vm0, %v3589_v0 }
 0xc10   :  { %3161 = vmatprep.subr.mxu1 %v3589_v0 }
 0xc11   :  { %3162 = vmatpush3.msra.mxu1 %v3791_v61 }
 0xc12   :  { %3163 = vmatprep.subr.mxu1 %v3589_v0 }
 0xc13   :  { %3164 = vmatpush3.msra.mxu1 %v3795_v62 }
 0xc14   :  { %3165 = vmatprep.subr.mxu1 %v3589_v0 }
 0xc15   :  { %3166 = vmatpush3.msra.mxu1 %v3799_v63 }
 0xc16   :  { %3181 = vmatprep.subr.mxu1 %v3589_v0 }
 0xcc6   :  { %v1010_v13 = vpop.f32.mrf.mxu1 }
 0xcc7   :  { %1015 = vrot.lane.b32.xlu1 %v1010_v13, %s3591_s4 }
 0xcc8   :  { %v3125_v19 = vpop.f32.mrf.mxu1 }
 0xcce   :  { %v1217_v20 = vpop.f32.mrf.mxu1 }
 0xcd0   :  { %v3147_v22 = vpop.f32.mrf.mxu1 }
 0xd39   :  { %v1016_v23 = vpop.permute.xlu1 %1015 }
 0xd3a   :  { %v1018_v28 = vadd.f32 %v1016_v23, %v3849_v12 }
 0xd3c   :  { %3344 = vtanh.f32 %v1018_v28 }
 0xd49   :  { %v3903_v30 = vpop.eup %3344 }
 0xd4a   :  { %1077 = vrot.lane.b32.xlu0 %v3903_v30, %s3592_s6 }
 0xdbc   :  { %v1078_v32 = vpop.permute.xlu0 %1077 }
 0xdbd   :  { %3135 = vmatmul.mubr.msk.f32.vlgmr.msra.gmra.mxu0 %vm153_vm1, %v1078_v32 }
 0xdbe   :  { %3149 = vmatpush3.msra.mxu0 %v3732_v26  ;;  %3156 = vmatprep.mubr.msk.f32.mxu0 %vm3590_vm0, %v3589_v0 }
 0xdbf   :  { %3150 = vmatprep.subr.mxu0 %v3589_v0 }
 0xdc0   :  { %3151 = vmatpush3.msra.mxu0 %v3740_v29 }
 0xdc1   :  { %3152 = vmatprep.subr.mxu0 %v3589_v0 }
 0xdc2   :  { %3153 = vmatpush3.msra.mxu0 %v3753_v34 }
 0xdc3   :  { %3154 = vmatprep.subr.mxu0 %v3589_v0 }
 0xdc4   :  { %3155 = vmatpush3.msra.mxu0 %v3759_v35 }
 0xdc5   :  { %3170 = vmatprep.subr.mxu0 %v3589_v0 }
 0xe7d   :  { %v3918_v12 = vpop.f32.mrf.mxu0 }
 0xe7e   :  { %1229 = vrot.lane.b32.xlu1 %v3918_v12, %s3579_s12  ;;  %v1221_v36 = vadd.f32 %v3918_v12, %v3771_v42 }
 0xe7f   :  { %v3136_v33 = vpop.f32.mrf.mxu0 }
 0xe80   :  { %v2870_v37 = vmul.f32 -1.442695, %v1221_v36 }
 0xe82   :  { %3346 = vpow2.f32 %v2870_v37 }
 0xe8f   :  { %v3347_v38 = vpop.eup %3346 }
 0xe90   :  { %v1225_v39 = vadd.f32 1.0, %v3347_v38 }
 0xe92   :  { %3348 = vrcp.f32 %v1225_v39 }
 0xe9f   :  { %v3349_v40 = vpop.eup %3348 }
 0xea0   :  { %v1239_v49 = vsub.f32 1.0, %v3349_v40 }
 0xef0   :  { %v1230_v41 = vpop.permute.xlu1 %1229 }
 0xef1   :  { %v1232_v43 = vmul.f32 %v3349_v40, %v1230_v41 }
 0xef3   :  { %1234 = vrot.lane.b32.xlu0 %v1232_v43, %s3579_s12 }
 0xef7   :  { %1245 = vrot.lane.b32.xlu0 %v3903_v30, %s3579_s12 }
 0xefb   :  { %1333 = vrot.lane.b32.xlu0 %v1217_v20, %s3579_s12 }
 0xf65   :  { %v1235_v44 = vpop.permute.xlu0 %1234 }
 0xf66   :  { %v1237_v46 = vadd.f32 %v1235_v44, %v3771_v42 }
 0xf68   :  { %3350 = vtanh.f32 %v1237_v46 }
 0xf69   :  { %v1246_v48 = vpop.permute.xlu0 %1245 }
 0xf6a   :  { %v1248_v51 = vmul.f32 %v3349_v40, %v1246_v48 }
 0xf6d   :  { %v1334_v3 = vpop.permute.xlu0 %1333 }
 0xf75   :  { %v3351_v47 = vpop.eup %3350 }
 0xf76   :  { %1241 = vrot.lane.b32.xlu1 %v3351_v47, %s3591_s4 }
 0xfe8   :  { %v1242_v50 = vpop.permute.xlu1 %1241 }
 0xfe9   :  { %v1244_v52 = vmul.f32 %v1242_v50, %v1239_v49 }
 0xfeb   :  { %v1249_v53 = vadd.f32 %v1248_v51, %v1244_v52 }
 0xfed   :  { %1251 = vrot.lane.b32.xlu1 %v1249_v53, %s3591_s4 }
0x105f   :  { %v1252_v11 = vpop.permute.xlu1 %1251 }
0x1060   :  { %3157 = vmatmul.mubr.msk.f32.vlgmr.msra.gmra.mxu0 %vm153_vm1, %v1252_v11 }
0x1061   :  { %3171 = vmatpush3.msra.mxu0 %v3691_v2  ;;  %3178 = vmatprep.mubr.msk.f32.mxu0 %vm3590_vm0, %v3589_v0 }
0x1062   :  { %3172 = vmatprep.subr.mxu0 %v3589_v0 }
0x1063   :  { %3173 = vmatpush3.msra.mxu0 %v3694_v4 }
0x1064   :  { %3174 = vmatprep.subr.mxu0 %v3589_v0 }
0x1065   :  { %3175 = vmatpush3.msra.mxu0 %v3698_v6 }
0x1066   :  { %3176 = vmatprep.subr.mxu0 %v3589_v0 }
0x1067   :  { %3177 = vmatpush3.msra.mxu0 %v3703_v8 }
0x1068   :  { %3192 = vmatprep.subr.mxu0 %v3589_v0 }
0x1120   :  { %v1321_v54 = vpop.f32.mrf.mxu0 }
0x1121   :  { %v1325_v55 = vadd.f32 %v1321_v54, %v1217_v20 }
0x1122   :  { %v3158_v56 = vpop.f32.mrf.mxu0 }
0x1123   :  { %v2872_v57 = vmul.f32 -1.442695, %v1325_v55 }
0x1125   :  { %3352 = vpow2.f32 %v2872_v57 }
0x1132   :  { %v3353_v58 = vpop.eup %3352 }
0x1133   :  { %v1329_v59 = vadd.f32 1.0, %v3353_v58 }
0x1135   :  { %3354 = vrcp.f32 %v1329_v59 }
0x1142   :  { %v3355_v1 = vpop.eup %3354 }
0x1143   :  { %v1336_v5 = vmul.f32 %v3355_v1, %v1334_v3  ;;  %v1343_v14 = vsub.f32 1.0, %v3355_v1  ;;  %v1349_v16 = vmul.f32 %v3355_v1, %v3875_v17 }
0x1145   :  { %1338 = vrot.lane.b32.xlu1 %v1336_v5, %s3579_s12 }
0x11b7   :  { %v1339_v7 = vpop.permute.xlu1 %1338 }
0x11b8   :  { %v1341_v9 = vadd.f32 %v1339_v7, %v1321_v54 }
0x11ba   :  { %3356 = vtanh.f32 %v1341_v9 }
0x11c7   :  { %v3357_v10 = vpop.eup %3356 }
0x11c8   :  { %1345 = vrot.lane.b32.xlu0 %v3357_v10, %s3591_s4 }
0x123a   :  { %v1346_v15 = vpop.permute.xlu0 %1345 }
0x123b   :  { %v1348_v18 = vmul.f32 %v1346_v15, %v1343_v14 }
0x123d   :  { %v3945_v13 = vadd.f32 %v1349_v16, %v1348_v18 }
0x123f   :  { %1352 = vrot.lane.b32.xlu1 %v3945_v13, %s3591_s4 }
0x12b1   :  { %v1353_v19 = vpop.permute.xlu1 %1352 }
0x12b2   :  { %3168 = vmatmul.mubr.msk.f32.vlgmr.msra.gmra.mxu1 %vm153_vm1, %v1353_v19 }
0x12b3   :  { %3182 = vmatpush3.msra.mxu1 %v3727_v24  ;;  %3189 = vmatprep.mubr.msk.f32.mxu1 %vm3590_vm0, %v3589_v0 }
0x12b4   :  { %3183 = vmatprep.subr.mxu1 %v3589_v0 }
0x12b5   :  { %3184 = vmatpush3.msra.mxu1 %v3729_v25 }
0x12b6   :  { %3185 = vmatprep.subr.mxu1 %v3589_v0 }
0x12b7   :  { %3186 = vmatpush3.msra.mxu1 %v3735_v27 }
0x12b8   :  { %3187 = vmatprep.subr.mxu1 %v3589_v0 }
0x12b9   :  { %3188 = vmatpush3.msra.mxu1 %v3743_v31 }
0x12ba   :  { %3190 = vmatmul.mubr.msk.f32.vlgmr.msra.gmra.mxu1 %vm153_vm1, %v1353_v19  ;;  %3203 = vmatprep.subr.mxu1 %v3589_v0 }
0x12bb   :  { %3204 = vmatpush3.msra.mxu1 %v3789_v60  ;;  %3211 = vmatprep.mubr.msk.f32.mxu1 %vm3590_vm0, %v3589_v0 }
0x12bc   :  { %3205 = vmatprep.subr.mxu1 %v3589_v0 }
0x12bd   :  { %3206 = vmatpush3.msra.mxu1 %v3791_v61 }
0x12be   :  { %3207 = vmatprep.subr.mxu1 %v3589_v0 }
0x12bf   :  { %3208 = vmatpush3.msra.mxu1 %v3795_v62 }
0x12c0   :  { %3209 = vmatprep.subr.mxu1 %v3589_v0 }
0x12c1   :  { %3210 = vmatpush3.msra.mxu1 %v3799_v63 }
0x12c2   :  { %3225 = vmatprep.subr.mxu1 %v3589_v0 }
0x1372   :  { %v1422_v17 = vpop.f32.mrf.mxu1 }
0x1373   :  { %1427 = vrot.lane.b32.xlu0 %v1422_v17, %s3591_s4 }
0x1374   :  { %v3169_v20 = vpop.f32.mrf.mxu1 }
0x137a   :  { %v1629_v22 = vpop.f32.mrf.mxu1 }
0x137c   :  { %v3191_v23 = vpop.f32.mrf.mxu1 }
0x13e5   :  { %v1428_v28 = vpop.permute.xlu0 %1427 }
0x13e6   :  { %v1430_v32 = vadd.f32 %v1428_v28, %v3918_v12 }
0x13e8   :  { %3358 = vtanh.f32 %v1430_v32 }
0x13f5   :  { %v3973_v33 = vpop.eup %3358 }
0x13f6   :  { %1489 = vrot.lane.b32.xlu1 %v3973_v33, %s3592_s6  ;;  %v1659_v48 = vrot.slane %v3973_v33, 4 }
0x1468   :  { %v1490_v36 = vpop.permute.xlu1 %1489 }
0x1469   :  { %3179 = vmatmul.mubr.msk.f32.vlgmr.msra.gmra.mxu0 %vm153_vm1, %v1490_v36 }
0x146a   :  { %3193 = vmatpush3.msra.mxu0 %v3732_v26  ;;  %3200 = vmatprep.mubr.msk.f32.mxu0 %vm3590_vm0, %v3589_v0 }
0x146b   :  { %3194 = vmatprep.subr.mxu0 %v3589_v0 }
0x146c   :  { %3195 = vmatpush3.msra.mxu0 %v3740_v29 }
0x146d   :  { %3196 = vmatprep.subr.mxu0 %v3589_v0 }
0x146e   :  { %3197 = vmatpush3.msra.mxu0 %v3753_v34 }
0x146f   :  { %3198 = vmatprep.subr.mxu0 %v3589_v0 }
0x1470   :  { %3199 = vmatpush3.msra.mxu0 %v3759_v35 }
0x1471   :  { %3214 = vmatprep.subr.mxu0 %v3589_v0 }
0x1529   :  { %v3988_v12 = vpop.f32.mrf.mxu0 }
0x152a   :  { %v1634_v37 = vrot.slane %v3988_v12, 4 }
0x152b   :  { %v3180_v38 = vpop.f32.mrf.mxu0 }
0x152c   :  { %1643 = vrot.lane.b32.xlu0 %v1634_v37, %s3579_s12  ;;  %v1636_v39 = vadd.f32 %v1634_v37, %v3771_v42 }
0x152e   :  { %v2876_v40 = vmul.f32 -1.442695, %v1636_v39 }
0x1530   :  { %3360 = vpow2.f32 %v2876_v40 }
0x153d   :  { %v3361_v41 = vpop.eup %3360 }
0x153e   :  { %v1640_v43 = vadd.f32 1.0, %v3361_v41 }
0x1540   :  { %3362 = vrcp.f32 %v1640_v43 }
0x154d   :  { %v3363_v44 = vpop.eup %3362 }
0x154e   :  { %v1653_v53 = vsub.f32 1.0, %v3363_v44 }
0x159e   :  { %v1644_v46 = vpop.permute.xlu0 %1643 }
0x159f   :  { %v1646_v47 = vmul.f32 %v3363_v44, %v1644_v46 }
0x15a1   :  { %1648 = vrot.lane.b32.xlu1 %v1646_v47, %s3579_s12 }
0x15a5   :  { %1660 = vrot.lane.b32.xlu1 %v1659_v48, %s3579_s12 }
0x15a9   :  { %1749 = vrot.lane.b32.xlu1 %v1629_v22, %s3579_s12 }
0x1613   :  { %v1649_v49 = vpop.permute.xlu1 %1648 }
0x1614   :  { %v1651_v50 = vadd.f32 %v1649_v49, %v3771_v42 }
0x1616   :  { %3364 = vtanh.f32 %v1651_v50  ;;  %v3418_v50 = vld [vmem:[#allocation7 + $0x18] sm:$0xff] }
0x1617   :  { %v1661_v52 = vpop.permute.xlu1 %1660 }
0x1618   :  { %v1663_v54 = vmul.f32 %v3363_v44, %v1661_v52  ;;  %v3420_v52 = vld [vmem:[#allocation7 + $0x8] sm:$0xff] }
0x1623   :  { %v3365_v51 = vpop.eup %3364 }
0x1624   :  { %1655 = vrot.lane.b32.xlu0 %v3365_v51, %s3591_s4  ;;  %v3419_v51 = vld [vmem:[#allocation7 + $0x10] sm:$0xff] }
0x1696   :  { %v1656_v11 = vpop.permute.xlu0 %1655 }
0x1697   :  { %v1658_v55 = vmul.f32 %v1656_v11, %v1653_v53  ;;  %v3421_v53 = vld [vmem:[#allocation7] sm:$0xff] }
0x1699   :  { %v1664_v56 = vadd.f32 %v1663_v54, %v1658_v55 }
0x169b   :  { %v1666_v57 = vrot.slane %v1664_v56, 4 }
0x169d   :  { %1667 = vrot.lane.b32.xlu0 %v1666_v57, %s3591_s4 }
0x170f   :  { %v1668_v58 = vpop.permute.xlu0 %1667 }
0x1710   :  { %3201 = vmatmul.mubr.msk.f32.vlgmr.msra.gmra.mxu0 %vm153_vm1, %v1668_v58 }
0x1711   :  { %3215 = vmatpush3.msra.mxu0 %v3691_v2  ;;  %3222 = vmatprep.mubr.msk.f32.mxu0 %vm3590_vm0, %v3589_v0 }
0x1712   :  { %3216 = vmatprep.subr.mxu0 %v3589_v0 }
0x1713   :  { %3217 = vmatpush3.msra.mxu0 %v3694_v4  ;;  %v1750_v4 = vpop.permute.xlu1 %1749 }
0x1714   :  { %3218 = vmatprep.subr.mxu0 %v3589_v0 }
0x1715   :  { %3219 = vmatpush3.msra.mxu0 %v3698_v6 }
0x1716   :  { %3220 = vmatprep.subr.mxu0 %v3589_v0 }
0x1717   :  { %3221 = vmatpush3.msra.mxu0 %v3703_v8 }
0x1718   :  { %3236 = vmatprep.subr.mxu0 %v3589_v0 }
0x17d0   :  { %v1737_v42 = vpop.f32.mrf.mxu0 }
0x17d1   :  { %v1741_v59 = vadd.f32 %v1737_v42, %v1629_v22 }
0x17d2   :  { %v3202_v2 = vpop.f32.mrf.mxu0 }
0x17d3   :  { %v2878_v1 = vmul.f32 -1.442695, %v1741_v59 }
0x17d5   :  { %3366 = vpow2.f32 %v2878_v1 }
0x17e2   :  { %v3367_v3 = vpop.eup %3366 }
0x17e3   :  { %v1745_v5 = vadd.f32 1.0, %v3367_v3 }
0x17e5   :  { %3368 = vrcp.f32 %v1745_v5 }
0x17f2   :  { %v3369_v7 = vpop.eup %3368 }
0x17f3   :  { %v1752_v9 = vmul.f32 %v3369_v7, %v1750_v4  ;;  %v1759_v8 = vsub.f32 1.0, %v3369_v7  ;;  %v1765_v16 = vmul.f32 %v3369_v7, %v3945_v13 }
0x17f5   :  { %1754 = vrot.lane.b32.xlu0 %v1752_v9, %s3579_s12 }
0x1867   :  { %v1755_v6 = vpop.permute.xlu0 %1754 }
0x1868   :  { %v1757_v10 = vadd.f32 %v1755_v6, %v1737_v42 }
0x186a   :  { %3370 = vtanh.f32 %v1757_v10 }
0x1877   :  { %v3371_v14 = vpop.eup %3370 }
0x1878   :  { %1761 = vrot.lane.b32.xlu1 %v3371_v14, %s3591_s4 }
0x18ea   :  { %v1762_v15 = vpop.permute.xlu1 %1761 }
0x18eb   :  { %v1764_v18 = vmul.f32 %v1762_v15, %v1759_v8  ;;  %v3422_v8 = vld [vmem:[#allocation10 + $0x18] sm:$0xff]  ;;  %v3423_v15 = vld [vmem:[#allocation10 + $0x10] sm:$0xff] }
0x18ed   :  { %v4014_v19 = vadd.f32 %v1765_v16, %v1764_v18  ;;  %v3424_v16 = vld [vmem:[#allocation10 + $0x8] sm:$0xff]  ;;  %v3425_v18 = vld [vmem:[#allocation10] sm:$0xff] }
0x18ef   :  { %1768 = vrot.lane.b32.xlu0 %v4014_v19, %s3591_s4 }
0x1961   :  { %v1769_v17 = vpop.permute.xlu0 %1768 }
0x1962   :  { %3212 = vmatmul.mubr.msk.f32.vlgmr.msra.gmra.mxu1 %vm153_vm1, %v1769_v17 }
0x1963   :  { %3226 = vmatpush3.msra.mxu1 %v3727_v24  ;;  %3233 = vmatprep.mubr.msk.f32.mxu1 %vm3590_vm0, %v3589_v0 }
0x1964   :  { %3227 = vmatprep.subr.mxu1 %v3589_v0 }
0x1965   :  { %3228 = vmatpush3.msra.mxu1 %v3729_v25 }
0x1966   :  { %3229 = vmatprep.subr.mxu1 %v3589_v0 }
0x1967   :  { %3230 = vmatpush3.msra.mxu1 %v3735_v27 }
0x1968   :  { %3231 = vmatprep.subr.mxu1 %v3589_v0 }
0x1969   :  { %3232 = vmatpush3.msra.mxu1 %v3743_v31 }
0x196a   :  { %3234 = vmatmul.mubr.msk.f32.vlgmr.msra.gmra.mxu1 %vm153_vm1, %v1769_v17  ;;  %3247 = vmatprep.subr.mxu1 %v3589_v0 }
0x196b   :  { %3248 = vmatpush3.msra.mxu1 %v3789_v60  ;;  %3255 = vmatprep.mubr.msk.f32.mxu1 %vm3590_vm0, %v3589_v0 }
0x196c   :  { %3249 = vmatprep.subr.mxu1 %v3589_v0 }
0x196d   :  { %3250 = vmatpush3.msra.mxu1 %v3791_v61 }
0x196e   :  { %3251 = vmatprep.subr.mxu1 %v3589_v0 }
0x196f   :  { %3252 = vmatpush3.msra.mxu1 %v3795_v62 }
0x1970   :  { %3253 = vmatprep.subr.mxu1 %v3589_v0 }
0x1971   :  { %3254 = vmatpush3.msra.mxu1 %v3799_v63 }
0x1972   :  { %3269 = vmatprep.subr.mxu1 %v3589_v0 }
0x1a22   :  { %v1838_v24 = vpop.f32.mrf.mxu1 }
0x1a23   :  { %1843 = vrot.lane.b32.xlu1 %v1838_v24, %s3591_s4 }
0x1a24   :  { %v3213_v25 = vpop.f32.mrf.mxu1 }
0x1a2a   :  { %v2045_v27 = vpop.f32.mrf.mxu1 }
0x1a2c   :  { %v3235_v31 = vpop.f32.mrf.mxu1 }
0x1a95   :  { %v1844_v13 = vpop.permute.xlu1 %1843 }
0x1a96   :  { %v1846_v20 = vadd.f32 %v1844_v13, %v3988_v12  ;;  %v3428_v13 = vld [vmem:[#allocation9 + $0x8] sm:$0xff] }
0x1a98   :  { %3372 = vtanh.f32 %v1846_v20  ;;  %v3429_v20 = vld [vmem:[#allocation9] sm:$0xff] }
0x1aa5   :  { %v4042_v22 = vpop.eup %3372 }
0x1aa6   :  { %1905 = vrot.lane.b32.xlu0 %v4042_v22, %s3592_s6 }
0x1b18   :  { %v1906_v23 = vpop.permute.xlu0 %1905 }
0x1b19   :  { %3223 = vmatmul.mubr.msk.f32.vlgmr.msra.gmra.mxu0 %vm153_vm1, %v1906_v23 }
0x1b1a   :  { %3237 = vmatpush3.msra.mxu0 %v3732_v26  ;;  %3244 = vmatprep.mubr.msk.f32.mxu0 %vm3590_vm0, %v3589_v0 }
0x1b1b   :  { %3238 = vmatprep.subr.mxu0 %v3589_v0 }
0x1b1c   :  { %3239 = vmatpush3.msra.mxu0 %v3740_v29 }
0x1b1d   :  { %3240 = vmatprep.subr.mxu0 %v3589_v0 }
0x1b1e   :  { %3241 = vmatpush3.msra.mxu0 %v3753_v34 }
0x1b1f   :  { %3242 = vmatprep.subr.mxu0 %v3589_v0 }
0x1b20   :  { %3243 = vmatpush3.msra.mxu0 %v3759_v35 }
0x1b21   :  { %3258 = vmatprep.subr.mxu0 %v3589_v0 }
0x1bd9   :  { %v4057_v28 = vpop.f32.mrf.mxu0 }
0x1bda   :  { %2057 = vrot.lane.b32.xlu1 %v4057_v28, %s3579_s12  ;;  %v2049_v32 = vadd.f32 %v4057_v28, %v3774_v45 }
0x1bdb   :  { %v3224_v26 = vpop.f32.mrf.mxu0 }
0x1bdc   :  { %v2882_v29 = vmul.f32 -1.442695, %v2049_v32 }
0x1bde   :  { %3374 = vpow2.f32 %v2882_v29 }
0x1beb   :  { %v3375_v36 = vpop.eup %3374 }
0x1bec   :  { %v2053_v12 = vadd.f32 1.0, %v3375_v36 }
0x1bee   :  { %3376 = vrcp.f32 %v2053_v12 }
0x1bfb   :  { %v3377_v34 = vpop.eup %3376 }
0x1bfc   :  { %v2067_v43 = vsub.f32 1.0, %v3377_v34 }
0x1c4c   :  { %v2058_v37 = vpop.permute.xlu1 %2057 }
0x1c4d   :  { %v2060_v38 = vmul.f32 %v3377_v34, %v2058_v37 }
0x1c4f   :  { %2062 = vrot.lane.b32.xlu0 %v2060_v38, %s3579_s12 }
0x1c53   :  { %2073 = vrot.lane.b32.xlu0 %v4042_v22, %s3579_s12 }
0x1c57   :  { %2161 = vrot.lane.b32.xlu0 %v2045_v27, %s3579_s12 }
0x1cc1   :  { %v2063_v35 = vpop.permute.xlu0 %2062 }
0x1cc2   :  { %v2065_v39 = vadd.f32 %v2063_v35, %v3774_v45 }
0x1cc4   :  { %3378 = vtanh.f32 %v2065_v39 }
0x1cc5   :  { %v2074_v41 = vpop.permute.xlu0 %2073 }
0x1cc6   :  { %v2076_v46 = vmul.f32 %v3377_v34, %v2074_v41 }
0x1cc9   :  { %v2162_v59 = vpop.permute.xlu0 %2161 }
0x1cd1   :  { %v3379_v40 = vpop.eup %3378 }
0x1cd2   :  { %2069 = vrot.lane.b32.xlu1 %v3379_v40, %s3591_s4 }
0x1d44   :  { %v2070_v44 = vpop.permute.xlu1 %2069 }
0x1d45   :  { %v2072_v47 = vmul.f32 %v2070_v44, %v2067_v43 }
0x1d47   :  { %v2077_v48 = vadd.f32 %v2076_v46, %v2072_v47 }
0x1d49   :  { %2079 = vrot.lane.b32.xlu1 %v2077_v48, %s3591_s4 }
0x1dbb   :  { %v2080_v49 = vpop.permute.xlu1 %2079 }
0x1dbc   :  { %3245 = vmatmul.mubr.msk.f32.vlgmr.msra.gmra.mxu0 %vm153_vm1, %v2080_v49 }
0x1dbd   :  { %3259 = vmatpush3.msra.mxu0 %v3418_v50  ;;  %3266 = vmatprep.mubr.msk.f32.mxu0 %vm3590_vm0, %v3589_v0 }
0x1dbe   :  { %3260 = vmatprep.subr.mxu0 %v3589_v0 }
0x1dbf   :  { %3261 = vmatpush3.msra.mxu0 %v3419_v51 }
0x1dc0   :  { %3262 = vmatprep.subr.mxu0 %v3589_v0 }
0x1dc1   :  { %3263 = vmatpush3.msra.mxu0 %v3420_v52 }
0x1dc2   :  { %3264 = vmatprep.subr.mxu0 %v3589_v0 }
0x1dc3   :  { %3265 = vmatpush3.msra.mxu0 %v3421_v53 }
0x1dc4   :  { %3280 = vmatprep.subr.mxu0 %v3589_v0 }
0x1e7c   :  { %v2149_v11 = vpop.f32.mrf.mxu0 }
0x1e7d   :  { %v2153_v54 = vadd.f32 %v2149_v11, %v2045_v27 }
0x1e7e   :  { %v3246_v55 = vpop.f32.mrf.mxu0 }
0x1e7f   :  { %v2884_v56 = vmul.f32 -1.442695, %v2153_v54 }
0x1e81   :  { %3380 = vpow2.f32 %v2884_v56 }
0x1e8e   :  { %v3381_v57 = vpop.eup %3380 }
0x1e8f   :  { %v2157_v58 = vadd.f32 1.0, %v3381_v57 }
0x1e91   :  { %3382 = vrcp.f32 %v2157_v58 }
0x1e9e   :  { %v3383_v42 = vpop.eup %3382 }
0x1e9f   :  { %v2164_v2 = vmul.f32 %v3383_v42, %v2162_v59  ;;  %v2171_v7 = vsub.f32 1.0, %v3383_v42  ;;  %v2177_v9 = vmul.f32 %v3383_v42, %v4014_v19 }
0x1ea1   :  { %2166 = vrot.lane.b32.xlu1 %v2164_v2, %s3579_s12  ;;  %v3593_v2 = vmov 1966171168  }
0x1f13   :  { %v2167_v1 = vpop.permute.xlu1 %2166 }
0x1f14   :  { %v2169_v3 = vadd.f32 %v2167_v1, %v2149_v11  ;;  %v605_v1 = vunpack.c.l.s4 %v3593_v2 }
0x1f16   :  { %3384 = vtanh.f32 %v2169_v3  ;;  %v607_v3 = vlaneseq }
0x1f23   :  { %v3385_v5 = vpop.eup %3384 }
0x1f24   :  { %2173 = vrot.lane.b32.xlu0 %v3385_v5, %s3591_s4  ;;  %v606_v5 = vunpack.c.0.s8 %v605_v1 }
0x1f96   :  { %v2174_v4 = vpop.permute.xlu0 %2173 }
0x1f97   :  { %v2176_v6 = vmul.f32 %v2174_v4, %v2171_v7  ;;  %v608_v7 = vshrl.u32 %v607_v3, 7 }
0x1f99   :  { %v4080_v10 = vadd.f32 %v2177_v9, %v2176_v6  ;;  %v4128_v4 = vsub.s32 %v606_v5, %v608_v7 }
0x1f9b   :  { %2180 = vrot.lane.b32.xlu1 %v4080_v10, %s3591_s4  ;;  %v4132_v6 = vrot.slane %v3834_v21, %v4128_v4 }
0x200d   :  { %v2181_v14 = vpop.permute.xlu1 %2180 }
0x200e   :  { %3256 = vmatmul.mubr.msk.f32.vlgmr.msra.gmra.mxu1 %vm153_vm1, %v2181_v14 }
0x200f   :  { %3270 = vmatpush3.msra.mxu1 %v3422_v8  ;;  %3277 = vmatprep.mubr.msk.f32.mxu1 %vm3590_vm0, %v3589_v0 }
0x2010   :  { %3271 = vmatprep.subr.mxu1 %v3589_v0 }
0x2011   :  { %3272 = vmatpush3.msra.mxu1 %v3423_v15 }
0x2012   :  { %3273 = vmatprep.subr.mxu1 %v3589_v0 }
0x2013   :  { %3274 = vmatpush3.msra.mxu1 %v3424_v16 }
0x2014   :  { %3275 = vmatprep.subr.mxu1 %v3589_v0 }
0x2015   :  { %3276 = vmatpush3.msra.mxu1 %v3425_v18  ;;  %v618_v18 = vrot.slane %v4132_v6, %v4128_v4 }
0x2016   :  { %3278 = vmatmul.mubr.msk.f32.vlgmr.msra.gmra.mxu1 %vm153_vm1, %v2181_v14  ;;  %3291 = vmatprep.subr.mxu1 %v3589_v0 }
0x2017   :  { %3292 = vmatpush3.msra.mxu1 %v3789_v60  ;;  %3299 = vmatprep.mubr.msk.f32.mxu1 %vm3590_vm0, %v3589_v0 }
0x2018   :  { %3293 = vmatprep.subr.mxu1 %v3589_v0 }
0x2019   :  { %3294 = vmatpush3.msra.mxu1 %v3791_v61 }
0x201a   :  { %3295 = vmatprep.subr.mxu1 %v3589_v0 }
0x201b   :  { %3296 = vmatpush3.msra.mxu1 %v3795_v62  ;;  %v3426_v62 = vld [vmem:[#allocation9 + $0x18] sm:$0xff] }
0x201c   :  { %3297 = vmatprep.subr.mxu1 %v3589_v0 }
0x201d   :  { %3298 = vmatpush3.msra.mxu1 %v3799_v63  ;;  %v3427_v63 = vld [vmem:[#allocation9 + $0x10] sm:$0xff] }
0x20ce   :  { %v2250_v19 = vpop.f32.mrf.mxu1 }
0x20cf   :  { %2255 = vrot.lane.b32.xlu0 %v2250_v19, %s3591_s4  ;;  %v4137_v19 = vsub.s32 0, %v608_v7 }
0x20d0   :  { %v3257_v17 = vpop.f32.mrf.mxu1 }
0x20d1   :  { %v631_v17 = vrot.slane %v618_v18, %v4137_v19 }
0x20d6   :  { %v2457_v60 = vpop.f32.mrf.mxu1 }
0x20d8   :  { %v3279_v24 = vpop.f32.mrf.mxu1 }
0x20d9   :  { %v4143_v24 = vrot.slane %v3903_v30, %v4128_v4 }
0x2141   :  { %v2256_v25 = vpop.permute.xlu0 %2255 }
0x2142   :  { %v2258_v27 = vadd.f32 %v2256_v25, %v4057_v28 }
0x2144   :  { %3386 = vtanh.f32 %v2258_v27 }
0x2151   :  { %v4103_v31 = vpop.eup %3386 }
0x2152   :  { %2317 = vrot.lane.b32.xlu1 %v4103_v31, %s3592_s6 }
0x21c4   :  { %v2318_v61 = vpop.permute.xlu1 %2317 }
0x21c5   :  { %3267 = vmatmul.mubr.msk.f32.vlgmr.msra.gmra.mxu0 %vm153_vm1, %v2318_v61  ;;  %v4153_v61 = vrot.slane %v3973_v33, %v4128_v4 }
0x21c6   :  { %3281 = vmatpush3.msra.mxu0 %v3426_v62  ;;  %3288 = vmatprep.mubr.msk.f32.mxu0 %vm3590_vm0, %v3589_v0 }
0x21c7   :  { %3282 = vmatprep.subr.mxu0 %v3589_v0  ;;  %v1447_v62 = vrot.slane %v4153_v61, %v4128_v4 }
0x21c8   :  { %3283 = vmatpush3.msra.mxu0 %v3427_v63 }
0x21c9   :  { %3284 = vmatprep.subr.mxu0 %v3589_v0  ;;  %v1460_v63 = vrot.slane %v1447_v62, %v4137_v19 }
0x21ca   :  { %3285 = vmatpush3.msra.mxu0 %v3428_v13  ;;  %v1455_v13 = vcombine.high %v1447_v62, %v1447_v62 }
0x21cb   :  { %3286 = vmatprep.subr.mxu0 %v3589_v0  ;;  %v2487_v0 = vrot.slane %v4103_v31, 4 }
0x21cc   :  { %3287 = vmatpush3.msra.mxu0 %v3429_v20  ;;  %v4163_v20 = vrot.slane %v4042_v22, %v4128_v4  ;;  %v1468_v33 = vrot.slane %v1455_v13, %v4137_v19 }
0x21ce   :  { %v1856_v1 = vcombine.high %v4163_v20, %v4163_v20 }
0x21d0   :  { %v1870_v5 = vrot.slane %v1856_v1, %v4128_v4 }
0x21d2   :  { %v1880_v7 = vrot.slane %v1870_v5, %v4137_v19 }
0x2285   :  { %v4113_v23 = vpop.f32.mrf.mxu0 }
0x2286   :  { %v2462_v28 = vrot.slane %v4113_v23, 4 }
0x2287   :  { %v3268_v26 = vpop.f32.mrf.mxu0 }
0x2288   :  { %2471 = vrot.lane.b32.xlu0 %v2462_v28, %s3579_s12  ;;  %v2464_v32 = vadd.f32 %v2462_v28, %v3774_v45  ;;  %v1863_v28 = vrot.slane %v4163_v20, %v4128_v4 }
0x228a   :  { %v2888_v29 = vmul.f32 -1.442695, %v2464_v32  ;;  %v1876_v26 = vrot.slane %v1863_v28, %v4137_v19  ;;  %v1871_v32 = vcombine.high %v1863_v28, %v1863_v28 }
0x228c   :  { %3388 = vpow2.f32 %v2888_v29  ;;  %v4173_v29 = vrot.slane %v4103_v31, %v4128_v4  ;;  %v1884_v22 = vrot.slane %v1871_v32, %v4137_v19 }
0x2299   :  { %v3389_v36 = vpop.eup %3388 }
0x229a   :  { %v2468_v12 = vadd.f32 1.0, %v3389_v36  ;;  %v2275_v36 = vrot.slane %v4173_v29, %v4128_v4 }
0x229c   :  { %3390 = vrcp.f32 %v2468_v12  ;;  %v2288_v12 = vrot.slane %v2275_v36, %v4137_v19 }
0x22a9   :  { %v3391_v34 = vpop.eup %3390 }
0x22aa   :  { %v2481_v43 = vsub.f32 1.0, %v3391_v34 }
0x22fa   :  { %v2472_v37 = vpop.permute.xlu0 %2471 }
0x22fb   :  { %v2474_v38 = vmul.f32 %v3391_v34, %v2472_v37 }
0x22fd   :  { %2476 = vrot.lane.b32.xlu1 %v2474_v38, %s3579_s12 }
0x2301   :  { %2488 = vrot.lane.b32.xlu1 %v2487_v0, %s3579_s12 }
0x2305   :  { %2577 = vrot.lane.b32.xlu1 %v2457_v60, %s3579_s12 }
0x236f   :  { %v2477_v35 = vpop.permute.xlu1 %2476 }
0x2370   :  { %v2479_v39 = vadd.f32 %v2477_v35, %v3774_v45 }
0x2372   :  { %3392 = vtanh.f32 %v2479_v39 }
0x2373   :  { %v2489_v41 = vpop.permute.xlu1 %2488 }
0x2374   :  { %v2491_v46 = vmul.f32 %v3391_v34, %v2489_v41  ;;  %v2283_v34 = vcombine.high %v2275_v36, %v2275_v36 }
0x2376   :  { %v2296_v37 = vrot.slane %v2283_v34, %v4137_v19 }
0x2377   :  { %v2578_v56 = vpop.permute.xlu1 %2577 }
0x237f   :  { %v3393_v40 = vpop.eup %3392 }
0x2380   :  { %2483 = vrot.lane.b32.xlu0 %v3393_v40, %s3591_s4 }
0x23f2   :  { %v2484_v44 = vpop.permute.xlu0 %2483 }
0x23f3   :  { %v2486_v47 = vmul.f32 %v2484_v44, %v2481_v43 }
0x23f5   :  { %v2492_v48 = vadd.f32 %v2491_v46, %v2486_v47 }
0x23f7   :  { %v2494_v49 = vrot.slane %v2492_v48, 4  ;;  %v611_v48 = vcombine.high %v4132_v6, %v4132_v6  ;;  %v2268_v6 = vcombine.high %v4173_v29, %v4173_v29 }
0x23f9   :  { %2495 = vrot.lane.b32.xlu0 %v2494_v49, %s3591_s4  ;;  %v625_v49 = vrot.slane %v611_v48, %v4128_v4 }
0x246b   :  { %v2496_v50 = vpop.permute.xlu0 %2495 }
0x246c   :  { %3289 = vmatmul.mubr.msk.f32.vlgmr.msra.gmra.mxu0 %vm153_vm1, %v2496_v50 }
0x252c   :  { %v2565_v51 = vpop.f32.mrf.mxu0 }
0x252d   :  { %v2569_v52 = vadd.f32 %v2565_v51, %v2457_v60  ;;  %v626_v60 = vcombine.high %v618_v18, %v618_v18 }
0x252e   :  { %v3290_v53 = vpop.f32.mrf.mxu0 }
0x252f   :  { %v2890_v45 = vmul.f32 -1.442695, %v2569_v52  ;;  %v639_v21 = vrot.slane %v626_v60, %v4137_v19  ;;  %v635_v52 = vrot.slane %v625_v49, %v4137_v19  ;;  %v627_v53 = vcombine.high %v625_v49, %v625_v49 }
0x2531   :  { %3394 = vpow2.f32 %v2890_v45  ;;  %v1028_v45 = vcombine.high %v4143_v24, %v4143_v24 }
0x253e   :  { %v3395_v11 = vpop.eup %3394 }
0x253f   :  { %v2573_v54 = vadd.f32 1.0, %v3395_v11  ;;  %v643_v11 = vrot.slane %v627_v53, %v4137_v19 }
0x2541   :  { %3396 = vrcp.f32 %v2573_v54  ;;  %v1042_v54 = vrot.slane %v1028_v45, %v4128_v4 }
0x254e   :  { %v3397_v55 = vpop.eup %3396 }
0x254f   :  { %v2580_v57 = vmul.f32 %v3397_v55, %v2578_v56  ;;  %v2587_v9 = vsub.f32 1.0, %v3397_v55  ;;  %v2593_v8 = vmul.f32 %v3397_v55, %v4080_v10  ;;  %v1035_v10 = vrot.slane %v4143_v24, %v4128_v4 }
0x2550   :  { %v1052_v55 = vrot.slane %v1042_v54, %v4137_v19  ;;  %v1044_v56 = vcombine.high %v1042_v54, %v1042_v54 }
0x2551   :  { %2582 = vrot.lane.b32.xlu0 %v2580_v57, %s3579_s12  ;;  %v1048_v25 = vrot.slane %v1035_v10, %v4137_v19  ;;  %v1043_v27 = vcombine.high %v1035_v10, %v1035_v10  ;;  %v1440_v57 = vcombine.high %v4153_v61, %v4153_v61 }
0x2553   :  { %v1056_v30 = vrot.slane %v1043_v27, %v4137_v19 }
0x25c3   :  { %v2583_v58 = vpop.permute.xlu0 %2582 }
0x25c4   :  { %v2585_v42 = vadd.f32 %v2583_v58, %v2565_v51  ;;  %v1060_v58 = vrot.slane %v1044_v56, %v4137_v19 }
0x25c6   :  { %3398 = vtanh.f32 %v2585_v42  ;;  %v1454_v42 = vrot.slane %v1440_v57, %v4128_v4 }
0x25c8   :  { %v1456_v2 = vcombine.high %v1454_v42, %v1454_v42 }
0x25ca   :  { %v1472_v3 = vrot.slane %v1456_v2, %v4137_v19 }
0x25d3   :  { %v3399_v59 = vpop.eup %3398 }
0x25d4   :  { %2589 = vrot.lane.b32.xlu1 %v3399_v59, %s3591_s4  ;;  %v1464_v59 = vrot.slane %v1454_v42, %v4137_v19 }
0x2646   :  { %v2590_v14 = vpop.permute.xlu1 %2589 }
0x2647   :  { %v2592_v15 = vmul.f32 %v2590_v14, %v2587_v9  ;;  %v1872_v9 = vcombine.high %v1870_v5, %v1870_v5 }
0x2649   :  { %v2594_v16 = vadd.f32 %v2593_v8, %v2592_v15  ;;  %v1888_v14 = vrot.slane %v1872_v9, %v4137_v19  ;;  %v2282_v8 = vrot.slane %v2268_v6, %v4128_v4 }
0x264b   :  { %2596 = vrot.lane.b32.xlu0 %v2594_v16, %s3591_s4  ;;  %v2292_v15 = vrot.slane %v2282_v8, %v4137_v19  ;;  %v2284_v16 = vcombine.high %v2282_v8, %v2282_v8 }
0x264d   :  { %v2300_v18 = vrot.slane %v2284_v16, %v4137_v19 }
0x264f   :  { %644 = vrot.lane.b32.xlu0 %v631_v17, %s3592_s6 }
0x2653   :  { %648 = vrot.lane.b32.xlu0 %v639_v21, %s3592_s6 }
0x2657   :  { %1061 = vrot.lane.b32.xlu0 %v1048_v25, %s3592_s6 }
0x265b   :  { %1065 = vrot.lane.b32.xlu0 %v1056_v30, %s3592_s6 }
0x265f   :  { %1473 = vrot.lane.b32.xlu0 %v1460_v63, %s3592_s6 }
0x2663   :  { %1477 = vrot.lane.b32.xlu0 %v1468_v33, %s3592_s6 }
0x2667   :  { %1889 = vrot.lane.b32.xlu0 %v1876_v26, %s3592_s6 }
0x266b   :  { %1893 = vrot.lane.b32.xlu0 %v1884_v22, %s3592_s6 }
0x266f   :  { %2301 = vrot.lane.b32.xlu0 %v2288_v12, %s3592_s6 }
0x2673   :  { %2305 = vrot.lane.b32.xlu0 %v2296_v37, %s3592_s6 }
0x26bd   :  { %v2597_v31 = vpop.permute.xlu0 %2596 }
0x26be   :  { %3300 = vmatmul.mubr.msk.f32.vlgmr.msra.gmra.mxu1 %vm153_vm1, %v2597_v31 }
0x26c1   :  { %v645_v38 = vpop.permute.xlu0 %644 }
0x26c2   :  { %657 = vst.msk [vmem:[%s4400_s9] sm:$0x1] %vm656_vm2, %v645_v38 }
0x26c5   :  { %v649_v0 = vpop.permute.xlu0 %648 }
0x26c6   :  { %659 = vst.msk [vmem:[%s4400_s9 + $0x10] sm:$0x1] %vm656_vm2, %v649_v0 }
0x26c9   :  { %v1062_v35 = vpop.permute.xlu0 %1061 }
0x26ca   :  { %1073 = vst.msk [vmem:[%s4400_s9 + $0x1] sm:$0x1] %vm656_vm2, %v1062_v35 }
0x26cd   :  { %v1066_v39 = vpop.permute.xlu0 %1065 }
0x26ce   :  { %1075 = vst.msk [vmem:[%s4400_s9 + $0x11] sm:$0x1] %vm656_vm2, %v1066_v39 }
0x26d1   :  { %v1474_v40 = vpop.permute.xlu0 %1473 }
0x26d2   :  { %1485 = vst.msk [vmem:[%s4400_s9 + $0x2] sm:$0x1] %vm656_vm2, %v1474_v40 }
0x26d5   :  { %v1478_v41 = vpop.permute.xlu0 %1477 }
0x26d6   :  { %1487 = vst.msk [vmem:[%s4400_s9 + $0x12] sm:$0x1] %vm656_vm2, %v1478_v41 }
0x26d9   :  { %v1890_v43 = vpop.permute.xlu0 %1889 }
0x26da   :  { %1901 = vst.msk [vmem:[%s4400_s9 + $0x3] sm:$0x1] %vm656_vm2, %v1890_v43 }
0x26dd   :  { %v1894_v44 = vpop.permute.xlu0 %1893 }
0x26de   :  { %1903 = vst.msk [vmem:[%s4400_s9 + $0x13] sm:$0x1] %vm656_vm2, %v1894_v44 }
0x26e1   :  { %v2302_v46 = vpop.permute.xlu0 %2301 }
0x26e2   :  { %2313 = vst.msk [vmem:[%s4400_s9 + $0x4] sm:$0x1] %vm656_vm2, %v2302_v46 }
0x26e5   :  { %v2306_v47 = vpop.permute.xlu0 %2305 }
0x26e6   :  { %2315 = vst.msk [vmem:[%s4400_s9 + $0x14] sm:$0x1] %vm656_vm2, %v2306_v47 }
0x277e   :  { %v2666_v50 = vpop.f32.mrf.mxu1 }
0x277f   :  { %2671 = vrot.lane.b32.xlu1 %v2666_v50, %s3591_s4 }
0x2780   :  { %v3301_v51 = vpop.f32.mrf.mxu1 }
0x2783   :  { %646 = vrot.lane.b32.xlu1 %v635_v52, %s3592_s6 }
0x2787   :  { %650 = vrot.lane.b32.xlu1 %v643_v11, %s3592_s6 }
0x278b   :  { %1063 = vrot.lane.b32.xlu1 %v1052_v55, %s3592_s6 }
0x278f   :  { %1067 = vrot.lane.b32.xlu1 %v1060_v58, %s3592_s6 }
0x2793   :  { %1475 = vrot.lane.b32.xlu1 %v1464_v59, %s3592_s6 }
0x2797   :  { %1479 = vrot.lane.b32.xlu1 %v1472_v3, %s3592_s6 }
0x279b   :  { %1891 = vrot.lane.b32.xlu1 %v1880_v7, %s3592_s6 }
0x279f   :  { %1895 = vrot.lane.b32.xlu1 %v1888_v14, %s3592_s6 }
0x27a3   :  { %2303 = vrot.lane.b32.xlu1 %v2292_v15, %s3592_s6 }
0x27a7   :  { %2307 = vrot.lane.b32.xlu1 %v2300_v18, %s3592_s6 }
0x27f1   :  { %v2672_v17 = vpop.permute.xlu1 %2671 }
0x27f2   :  { %v2674_v60 = vadd.f32 %v2672_v17, %v4113_v23 }
0x27f4   :  { %3400 = vtanh.f32 %v2674_v60 }
0x27f5   :  { %v647_v24 = vpop.permute.xlu1 %646 }
0x27f6   :  { %658 = vst.msk [vmem:[%s4400_s9 + $0x8] sm:$0x1] %vm656_vm2, %v647_v24 }
0x27f9   :  { %v651_v21 = vpop.permute.xlu1 %650 }
0x27fa   :  { %660 = vst.msk [vmem:[%s4400_s9 + $0x18] sm:$0x1] %vm656_vm2, %v651_v21 }
0x27fd   :  { %v1064_v10 = vpop.permute.xlu1 %1063 }
0x27fe   :  { %1074 = vst.msk [vmem:[%s4400_s9 + $0x9] sm:$0x1] %vm656_vm2, %v1064_v10 }
0x2801   :  { %v3401_v23 = vpop.eup %3400  ;;  %v1068_v25 = vpop.permute.xlu1 %1067 }
0x2802   :  { %1076 = vst.msk [vmem:[%s4400_s9 + $0x19] sm:$0x1] %vm656_vm2, %v1068_v25  ;;  %v2683_v27 = vrot.slane %v3401_v23, %v4128_v4 }
0x2804   :  { %v2691_v61 = vrot.slane %v2683_v27, %v4128_v4  ;;  %v2684_v30 = vcombine.high %v2683_v27, %v2683_v27 }
0x2805   :  { %v1476_v62 = vpop.permute.xlu1 %1475 }
0x2806   :  { %1486 = vst.msk [vmem:[%s4400_s9 + $0xa] sm:$0x1] %vm656_vm2, %v1476_v62  ;;  %v2704_v63 = vrot.slane %v2691_v61, %v4137_v19  ;;  %v2698_v13 = vrot.slane %v2684_v30, %v4128_v4  ;;  %v2699_v20 = vcombine.high %v2691_v61, %v2691_v61 }
0x2808   :  { %2717 = vrot.lane.b32.xlu0 %v2704_v63, %s3592_s6  ;;  %v2708_v33 = vrot.slane %v2698_v13, %v4137_v19  ;;  %v2700_v28 = vcombine.high %v2698_v13, %v2698_v13  ;;  %v2712_v32 = vrot.slane %v2699_v20, %v4137_v19 }
0x2809   :  { %v1480_v26 = vpop.permute.xlu1 %1479 }
0x280a   :  { %1488 = vst.msk [vmem:[%s4400_s9 + $0x1a] sm:$0x1] %vm656_vm2, %v1480_v26  ;;  %2719 = vrot.lane.b32.xlu1 %v2708_v33, %s3592_s6  ;;  %v2716_v4 = vrot.slane %v2700_v28, %v4137_v19 }
0x280c   :  { %2721 = vrot.lane.b32.xlu0 %v2712_v32, %s3592_s6 }
0x280d   :  { %v1892_v29 = vpop.permute.xlu1 %1891 }
0x280e   :  { %1902 = vst.msk [vmem:[%s4400_s9 + $0xb] sm:$0x1] %vm656_vm2, %v1892_v29  ;;  %2723 = vrot.lane.b32.xlu1 %v2716_v4, %s3592_s6 }
0x2811   :  { %v1896_v22 = vpop.permute.xlu1 %1895 }
0x2812   :  { %1904 = vst.msk [vmem:[%s4400_s9 + $0x1b] sm:$0x1] %vm656_vm2, %v1896_v22 }
0x2815   :  { %v2304_v36 = vpop.permute.xlu1 %2303 }
0x2816   :  { %2314 = vst.msk [vmem:[%s4400_s9 + $0xc] sm:$0x1] %vm656_vm2, %v2304_v36 }
0x2819   :  { %v2308_v19 = vpop.permute.xlu1 %2307 }
0x281a   :  { %2316 = vst.msk [vmem:[%s4400_s9 + $0x1c] sm:$0x1] %vm656_vm2, %v2308_v19 }
0x287a   :  { %v2718_v12 = vpop.permute.xlu0 %2717 }
0x287b   :  { %2729 = vst.msk [vmem:[%s4400_s9 + $0x5] sm:$0x1] %vm656_vm2, %v2718_v12  ;;  %v2892_v12 = vld [vmem:[%s4398_s7] ss:$0 sm:$0xff] }
0x287c   :  { %v2720_v34 = vpop.permute.xlu1 %2719 }
0x287d   :  { %2730 = vst.msk [vmem:[%s4400_s9 + $0xd] sm:$0x1] %vm656_vm2, %v2720_v34 }
0x287e   :  { %v2722_v37 = vpop.permute.xlu0 %2721 }
0x287f   :  { %2731 = vst.msk [vmem:[%s4400_s9 + $0x15] sm:$0x1] %vm656_vm2, %v2722_v37 }
0x2880   :  { %v2724_v31 = vpop.permute.xlu1 %2723 }
0x2881   :  { %2732 = vst.msk [vmem:[%s4400_s9 + $0x1d] sm:$0x1] %vm656_vm2, %v2724_v31  ;;  %v2893_v31 = vld [vmem:[%s4399_s8] ss:$0 sm:$0xff] }
0x2882   :  { %v2733_v38 = vld [vmem:[%s4400_s9] sm:$0x3f] }
0x2883   :  { %v2738_v0 = vsel %vm2737_vm3, %v2733_v38, 0.0 }
0x2884   :  { %2739 = vadd.xlane.f32.xlu0 %v2738_v0  ;;  %v2734_v35 = vld [vmem:[%s4400_s9 + $0x8] sm:$0x3f] }
0x2885   :  { %v2741_v39 = vsel %vm2737_vm3, %v2734_v35, 0.0 }
0x2886   :  { %2742 = vadd.xlane.f32.xlu1 %v2741_v39  ;;  %v2735_v40 = vld [vmem:[%s4400_s9 + $0x10] sm:$0x3f] }
0x2887   :  { %v2744_v41 = vsel %vm2737_vm3, %v2735_v40, 0.0 }
0x2888   :  { %2745 = vadd.xlane.f32.xlu0 %v2744_v41  ;;  %v2736_v43 = vld [vmem:[%s4400_s9 + $0x18] sm:$0x3f] }
0x2889   :  { %v2747_v44 = vsel %vm2737_vm3, %v2736_v43, 0.0 }
0x288c   :  { %2748 = vadd.xlane.f32.xlu0 %v2747_v44 }
0x290d   :  { %v2740_v46 = vpop.xlane.xlu0 %2739 }
0x290e   :  { %v2751_v47 = vmul.f32 0.03125, %v2740_v46 }
0x290f   :  { %v2743_v48 = vpop.xlane.xlu1 %2742 }
0x2910   :  { %v4345_v49 = vsub.f32 %v2733_v38, %v2751_v47  ;;  %v2752_v50 = vmul.f32 0.03125, %v2743_v48 }
0x2911   :  { %v2746_v51 = vpop.xlane.xlu0 %2745 }
0x2912   :  { %v4347_v52 = vsub.f32 %v2734_v35, %v2752_v50  ;;  %v2753_v53 = vmul.f32 0.03125, %v2746_v51  ;;  %v2759_v45 = vmul.f32 %v4345_v49, %v4345_v49  ;;  %v2822_v34 = vmul.f32 %v2892_v12, %v4345_v49 }
0x2914   :  { %v4351_v11 = vsub.f32 %v2735_v40, %v2753_v53  ;;  %v2763_v54 = vsel %vm2737_vm3, %v2759_v45, 0.0  ;;  %v2760_v55 = vmul.f32 %v4347_v52, %v4347_v52  ;;  %v2823_v0 = vmul.f32 %v2892_v12, %v4347_v52 }
0x2915   :  { %2764 = vadd.xlane.f32.xlu1 %v2763_v54  ;;  %v2749_v56 = vpop.xlane.xlu0 %2748 }
0x2916   :  { %v2754_v57 = vmul.f32 0.03125, %v2749_v56  ;;  %v2766_v58 = vsel %vm2737_vm3, %v2760_v55, 0.0  ;;  %v2761_v42 = vmul.f32 %v4351_v11, %v4351_v11  ;;  %v2824_v39 = vmul.f32 %v2892_v12, %v4351_v11 }
0x2917   :  { %2767 = vadd.xlane.f32.xlu0 %v2766_v58 }
0x2918   :  { %v4359_v59 = vsub.f32 %v2736_v43, %v2754_v57  ;;  %v2769_v2 = vsel %vm2737_vm3, %v2761_v42, 0.0 }
0x2919   :  { %2770 = vadd.xlane.f32.xlu1 %v2769_v2 }
0x291a   :  { %v2762_v1 = vmul.f32 %v4359_v59, %v4359_v59  ;;  %v2825_v47 = vmul.f32 %v2892_v12, %v4359_v59 }
0x291c   :  { %v2772_v3 = vsel %vm2737_vm3, %v2762_v1, 0.0 }
0x291d   :  { %2773 = vadd.xlane.f32.xlu0 %v2772_v3 }
0x299e   :  { %v2765_v5 = vpop.xlane.xlu1 %2764 }
0x299f   :  { %v2775_v7 = vmul.f32 0.032258064, %v2765_v5 }
0x29a0   :  { %v2768_v9 = vpop.xlane.xlu0 %2767 }
0x29a1   :  { %3402 = vrsqrt.f32 %v2775_v7  ;;  %v2776_v6 = vmul.f32 0.032258064, %v2768_v9  ;;  %vm2781_vm4 = vcmp.eq.f32.partialorder %v2775_v7, inf  ;;  %v2784_v60 = vand.u32 2147483648, %v2775_v7 }
0x29a2   :  { %v2771_v14 = vpop.xlane.xlu1 %2770  ;;  %vm2783_vm5 = vcmp.eq.f32.partialorder %v2775_v7, 0.0 }
0x29a3   :  { %v2777_v8 = vmul.f32 0.032258064, %v2771_v14  ;;  %3404 = vrsqrt.f32 %v2776_v6  ;;  %vm2788_vm6 = vcmp.eq.f32.partialorder %v2776_v6, inf  ;;  %v2791_v61 = vand.u32 2147483648, %v2776_v6 }
0x29a4   :  { %vm2790_vm7 = vcmp.eq.f32.partialorder %v2776_v6, 0.0 }
0x29a5   :  { %3406 = vrsqrt.f32 %v2777_v8  ;;  %vm2795_vm8 = vcmp.eq.f32.partialorder %v2777_v8, inf  ;;  %v2798_v63 = vand.u32 2147483648, %v2777_v8  ;;  %vm2797_vm9 = vcmp.eq.f32.partialorder %v2777_v8, 0.0 }
0x29a6   :  { %v2774_v15 = vpop.xlane.xlu0 %2773 }
0x29a7   :  { %v2778_v16 = vmul.f32 0.032258064, %v2774_v15 }
0x29a9   :  { %3408 = vrsqrt.f32 %v2778_v16  ;;  %vm2802_vm10 = vcmp.eq.f32.partialorder %v2778_v16, inf  ;;  %v2805_v29 = vand.u32 2147483648, %v2778_v16  ;;  %vm2804_vm11 = vcmp.eq.f32.partialorder %v2778_v16, 0.0 }
0x29ae   :  { %v3403_v18 = vpop.eup %3402 }
0x29af   :  { %v2780_v17 = vmul.f32 %v3403_v18, %v2775_v7 }
0x29b0   :  { %v3405_v24 = vpop.eup %3404 }
0x29b1   :  { %v2782_v21 = vsel %vm2781_vm4, %v2775_v7, %v2780_v17  ;;  %v2787_v25 = vmul.f32 %v3405_v24, %v2776_v6 }
0x29b2   :  { %v3407_v10 = vpop.eup %3406  ;;  %v2785_v23 = vsel %vm2783_vm5, %v2784_v60, %v2782_v21 }
0x29b3   :  { %v2807_v27 = vadd.f32 1e-06, %v2785_v23  ;;  %v2794_v30 = vmul.f32 %v3407_v10, %v2777_v8  ;;  %v2789_v62 = vsel %vm2788_vm6, %v2776_v6, %v2787_v25 }
0x29b4   :  { %v2792_v13 = vsel %vm2790_vm7, %v2791_v61, %v2789_v62 }
0x29b5   :  { %3410 = vrcp.f32 %v2807_v27  ;;  %v2796_v20 = vsel %vm2795_vm8, %v2777_v8, %v2794_v30  ;;  %v2808_v28 = vadd.f32 1e-06, %v2792_v13 }
0x29b6   :  { %v3409_v33 = vpop.eup %3408  ;;  %v2799_v26 = vsel %vm2797_vm9, %v2798_v63, %v2796_v20 }
0x29b7   :  { %v2809_v32 = vadd.f32 1e-06, %v2799_v26  ;;  %v2801_v4 = vmul.f32 %v3409_v33, %v2778_v16  ;;  %3412 = vrcp.f32 %v2808_v28 }
0x29b9   :  { %3414 = vrcp.f32 %v2809_v32  ;;  %v2803_v22 = vsel %vm2802_vm10, %v2778_v16, %v2801_v4 }
0x29ba   :  { %v2806_v36 = vsel %vm2804_vm11, %v2805_v29, %v2803_v22 }
0x29bb   :  { %v2810_v19 = vadd.f32 1e-06, %v2806_v36 }
0x29bd   :  { %3416 = vrcp.f32 %v2810_v19 }
0x29c2   :  { %v3411_v37 = vpop.eup %3410 }
0x29c3   :  { %v2826_v38 = vmul.f32 %v3411_v37, %v2822_v34 }
0x29c4   :  { %v3413_v35 = vpop.eup %3412 }
0x29c5   :  { %v2837_v40 = vadd.f32 %v2893_v31, %v2826_v38  ;;  %v2827_v43 = vmul.f32 %v3413_v35, %v2823_v0 }
0x29c6   :  { %v3415_v41 = vpop.eup %3414 }
0x29c7   :  { %2841 = vst.msk [vmem:[%s4400_s9] sm:$0x3f] %vm2737_vm3, %v2837_v40  ;;  %v2828_v44 = vmul.f32 %v3415_v41, %v2824_v39  ;;  %v2838_v46 = vadd.f32 %v2893_v31, %v2827_v43 }
0x29c9   :  { %v2839_v48 = vadd.f32 %v2893_v31, %v2828_v44  ;;  %2842 = vst.msk [vmem:[%s4400_s9 + $0x8] sm:$0x3f] %vm2737_vm3, %v2838_v46 }
0x29ca   :  { %v3417_v49 = vpop.eup %3416 }
0x29cb   :  { %2843 = vst.msk [vmem:[%s4400_s9 + $0x10] sm:$0x3f] %vm2737_vm3, %v2839_v48  ;;  %v2829_v50 = vmul.f32 %v3417_v49, %v2825_v47 }
0x29cd   :  { %v2840_v51 = vadd.f32 %v2893_v31, %v2829_v50 }
0x29cf   :  { %2844 = vst.msk [vmem:[%s4400_s9 + $0x18] sm:$0x3f] %vm2737_vm3, %v2840_v51 }
0x29d0   :  { %2849 = vsyncpa [#allocation3], 1 }
0x29d1   :  { %2850 = vsyncpa [#allocation5], 1 }
0x29d2   :  { %2851 = vsyncpa [#allocation8], 1 }
0x29d3   :  { %2852 = vsyncpa [#allocation11], 1 }

</bundles_post_ra>
